<compile_context>
chip_gen: v7x
topology: tpu7x:2x2x1
jax: 0.10.0
libtpu: 0.0.40
codegen_flags: <defaults>
</compile_context>

<pallas_src>
import math
import functools

import jax
import jax.numpy as jnp
from jax.experimental import pallas as pl
from jax.experimental.pallas import tpu as pltpu


# Rows of the packed (8, C) f32 per-channel parameter slab (rows 2..7 = pad).
_PROJ_B, _FC2_B = 0, 1


# ----------------------------------------------------------------------------
# Pallas kernel: one full SelfAttnBlockApi (block_style='attn')
#   x = x + MHA(LN1(x)) ; x = x + MLP(LN2(x))
# ----------------------------------------------------------------------------
def _make_block_kernel(num_heads, head_dim, q_tile,
                       eps=1e-5, matmul_dtype=jnp.bfloat16):
    H = num_heads
    hd = head_dim
    C = H * hd
    tq = q_tile
    md = matmul_dtype
    inv_sqrt2 = 1.0 / math.sqrt(2.0)

    def layernorm(h):                       # affine folded into next linear host-side
        mu = jnp.mean(h, axis=-1, keepdims=True)
        d = h - mu
        var = jnp.mean(d * d, axis=-1, keepdims=True)
        return d * jax.lax.rsqrt(var + eps)

    def split_heads(t):                     # (rows, C) -> (H, rows, hd)
        return jnp.stack([t[:, h * hd:(h + 1) * hd] for h in range(H)], axis=0)

    def kernel(x_ref, vec_ref, qkvb_ref, fc1b_ref,
               qkvw_ref, projw_ref, fc1w_ref, fc2w_ref,
               o_ref, kv_ref):
        qi = pl.program_id(1)

        # ---- once per batch element: K/V for the whole sequence into scratch ----
        @pl.when(qi == 0)
        def _():
            x_all = x_ref[...].astype(jnp.float32)                      # (N, C)
            nx = layernorm(x_all)
            kv = jnp.dot(nx.astype(md), qkvw_ref[:, C:],                # (N, 2C) lane-dense
                         preferred_element_type=jnp.float32) + qkvb_ref[0:1, C:]
            kv = kv.astype(md)
            kv_ref[0] = split_heads(kv[:, :C])                          # K: (H, N, hd)
            kv_ref[1] = split_heads(kv[:, C:])                          # V: (H, N, hd)

        # ---- per Q-tile: Q projection + attention + proj + MLP ----
        row0 = pl.multiple_of(qi * tq, tq)
        xq = x_ref[pl.ds(row0, tq), :].astype(jnp.float32)              # (tq, C)
        nxq = layernorm(xq)
        # LN1 affine and softmax scale are folded into the q columns host-side.
        q = jnp.dot(nxq.astype(md), qkvw_ref[:, :C],                    # (tq, C) lane-dense
                    preferred_element_type=jnp.float32) + qkvb_ref[0:1, :C]
        qh = split_heads(q.astype(md))                                  # (H, tq, hd)

        kh = kv_ref[0]
        vh = kv_ref[1]
        att = jnp.einsum('hqd,hkd->hqk', qh, kh,
                         preferred_element_type=jnp.float32)            # (H, tq, N) f32
        att = att - jnp.max(att, axis=-1, keepdims=True)
        att = jnp.exp(att)
        att = att * pl.reciprocal(jnp.sum(att, axis=-1, keepdims=True), approx=True)

        outh = jnp.einsum('hqk,hkd->hqd', att.astype(md), vh,
                          preferred_element_type=jnp.float32)           # (H, tq, hd)
        # Head merge: lane concat -> single K=128 lane-dense projection matmul.
        out_merged = jnp.concatenate([outh[h] for h in range(H)], axis=-1)  # (tq, C)
        attn_out = jnp.dot(out_merged.astype(md), projw_ref[...],
                           preferred_element_type=jnp.float32) \
            + vec_ref[_PROJ_B:_PROJ_B + 1, :]
        xq = xq + attn_out                        # residual (ls1 / drop_path1 = Identity)

        # ---- norm2 + MLP (fc1 -> exact GELU -> fc2); LN2 affine folded into fc1 ----
        nx2 = layernorm(xq)
        h1 = jnp.dot(nx2.astype(md), fc1w_ref[...],
                     preferred_element_type=jnp.float32) + fc1b_ref[...]
        h1 = 0.5 * h1 * (1.0 + jax.lax.erf(h1 * inv_sqrt2))   # nn.GELU default (exact)
        h2 = jnp.dot(h1.astype(md), fc2w_ref[...],
                     preferred_element_type=jnp.float32) + vec_ref[_FC2_B:_FC2_B + 1, :]
        o_ref[...] = (xq + h2).astype(o_ref.dtype)            # (tq, C) lane-dense store

    return kernel


def run_block(x, params, *, num_heads, q_tile=None):
    B, N, C = x.shape
    H = num_heads
    hd = C // H
    hidden = params["fc1_w"].shape[1]
    tq = q_tile if q_tile is not None else min(128, N)
    assert C % H == 0 and N % tq == 0
    nq = N // tq

    kernel = _make_block_kernel(H, hd, tq, matmul_dtype=params["qkv_w"].dtype)

    def rep(arr):   # full-array block, replicated across the (b, qi) grid
        nd = arr.ndim
        return pl.BlockSpec(arr.shape, lambda b, qi, _nd=nd: (0,) * _nd)

    w_bytes = 2 * (C * 3 * C + C * C + 2 * C * hidden)          # bf16 weights
    cost = pl.CostEstimate(
        flops=int(B * (2 * N * C * 3 * C            # qkv projection
                       + 4 * N * N * C              # scores + att@v
                       + 2 * N * C * C              # output projection
                       + 4 * N * C * hidden)),      # fc1 + fc2
        transcendentals=int(B * (H * N * N + N * hidden)),
        bytes_accessed=int(2 * B * N * C * 4 + w_bytes),
    )

    return pl.pallas_call(
        kernel,
        out_shape=jax.ShapeDtypeStruct((B, N, C), x.dtype),
        grid=(B, nq),
        in_specs=[
            # full sequence per batch element (re-DMA'd only when b changes)
            pl.BlockSpec((None, N, C), lambda b, qi: (b, 0, 0)),
            rep(params["vecs"]),          # (8, C)   f32: proj_b / fc2_b rows
            rep(params["qkv_b"]),         # (1, 3C)  f32: LN1-bias fold (q-scaled)
            rep(params["fc1_b"]),         # (1, hid) f32: fc1 bias + LN2-bias fold
            rep(params["qkv_w"]),         # (C, 3C)  bf16 (LN1 affine + scale folded)
            rep(params["proj_w"]),        # (C, C)   bf16
            rep(params["fc1_w"]),         # (C, hid) bf16 (LN2 affine folded)
            rep(params["fc2_w"]),         # (hid, C) bf16
        ],
        out_specs=pl.BlockSpec((None, tq, C), lambda b, qi: (b, qi, 0)),
        scratch_shapes=[pltpu.VMEM((2, H, N, hd), params["qkv_w"].dtype)],
        compiler_params=pltpu.CompilerParams(
            dimension_semantics=("parallel", "arbitrary")),
        cost_estimate=cost,
    )(x, params["vecs"], params["qkv_b"], params["fc1_b"],
      params["qkv_w"], params["proj_w"], params["fc1_w"], params["fc2_w"])


# ----------------------------------------------------------------------------
# Parameter construction (deterministic, matches module shapes) + host folds
# ----------------------------------------------------------------------------
def init_block_params(key, dim, num_heads, mlp_ratio, matmul_dtype=jnp.bfloat16):
    hidden = int(dim * mlp_ratio)
    hd = dim // num_heads
    scale = hd ** -0.5
    ks = jax.random.split(key, 7)

    def randn(k, shape):
        return jax.random.normal(k, shape, jnp.float32) * 0.02

    # Raw (module-shaped, f32) parameters; LayerNorm affine at defaults (w=1,b=0).
    raw = dict(
        ln1_w=jnp.ones((dim,), jnp.float32), ln1_b=jnp.zeros((dim,), jnp.float32),
        ln2_w=jnp.ones((dim,), jnp.float32), ln2_b=jnp.zeros((dim,), jnp.float32),
        w_qkv=randn(ks[0], (dim, 3 * dim)),                  # y = x @ W (qkv_bias=False)
        w_proj=randn(ks[1], (dim, dim)), b_proj=randn(ks[2], (dim,)),
        w_fc1=randn(ks[3], (dim, hidden)), b_fc1=randn(ks[4], (hidden,)),
        w_fc2=randn(ks[5], (hidden, dim)), b_fc2=randn(ks[6], (dim,)),
    )

    # Fold LN1 affine + softmax scale into the qkv weight / induced bias.
    w_qkv_f = raw["w_qkv"] * raw["ln1_w"][:, None]
    b_qkv_f = raw["ln1_b"] @ raw["w_qkv"]
    w_qkv_f = w_qkv_f.at[:, :dim].multiply(scale)
    b_qkv_f = b_qkv_f.at[:dim].multiply(scale)

    # Fold LN2 affine into fc1.
    w_fc1_f = raw["w_fc1"] * raw["ln2_w"][:, None]
    b_fc1_f = raw["b_fc1"] + raw["ln2_b"] @ raw["w_fc1"]

    vecs = jnp.zeros((8, dim), jnp.float32)
    vecs = vecs.at[_PROJ_B].set(raw["b_proj"])
    vecs = vecs.at[_FC2_B].set(raw["b_fc2"])

    params = dict(
        vecs=vecs,
        qkv_b=b_qkv_f.reshape(1, 3 * dim),
        fc1_b=b_fc1_f.reshape(1, hidden),
        qkv_w=w_qkv_f.astype(matmul_dtype),
        proj_w=raw["w_proj"].astype(matmul_dtype),
        fc1_w=w_fc1_f.astype(matmul_dtype),
        fc2_w=raw["w_fc2"].astype(matmul_dtype),
    )
    return params, raw


# ----------------------------------------------------------------------------
# Pure-JAX f32 reference (mirrors the PyTorch 'attn' path) — for validation
# ----------------------------------------------------------------------------
def reference_forward(x, raw, num_heads, eps=1e-5):
    B, N, C = x.shape
    H, hd = num_heads, C // num_heads

    def ln(h, w, b):
        mu = jnp.mean(h, -1, keepdims=True)
        var = jnp.mean((h - mu) ** 2, -1, keepdims=True)
        return (h - mu) / jnp.sqrt(var + eps) * w + b

    nx = ln(x, raw["ln1_w"], raw["ln1_b"])
    qkv = nx @ raw["w_qkv"]
    q, k, v = jnp.split(qkv, 3, axis=-1)

    def heads(t):
        return t.reshape(B, N, H, hd).transpose(0, 2, 1, 3)

    q, k, v = heads(q), heads(k), heads(v)
    att = jnp.einsum('bhqd,bhkd->bhqk', q, k) * hd ** -0.5
    att = jax.nn.softmax(att, axis=-1)
    out = jnp.einsum('bhqk,bhkd->bhqd', att, v).transpose(0, 2, 1, 3).reshape(B, N, C)
    x = x + out @ raw["w_proj"] + raw["b_proj"]
    nx2 = ln(x, raw["ln2_w"], raw["ln2_b"])
    h1 = nx2 @ raw["w_fc1"] + raw["b_fc1"]
    h1 = 0.5 * h1 * (1.0 + jax.lax.erf(h1 / math.sqrt(2.0)))
    return x + h1 @ raw["w_fc2"] + raw["b_fc2"]


class SelfAttnBlockApiPallas:
    """Pallas TPU implementation of SelfAttnBlockApi with block_style='attn'
    (Norm Encoder Block).  drop / attn_drop / drop_path = 0 and
    init_values=None, so Dropout / DropPath / LayerScale are Identity."""

    def __init__(self, key, dim=128, num_heads=4, mlp_ratio=4.0,
                 matmul_dtype=jnp.bfloat16, q_tile=None):
        self.num_heads = num_heads
        self.params, self.raw = init_block_params(key, dim, num_heads, mlp_ratio,
                                                  matmul_dtype)
        self._forward = jax.jit(functools.partial(run_block, num_heads=num_heads,
                                                  q_tile=q_tile))

    def __call__(self, x, pos=None, idx=None):
        # pos / idx are not consumed by the 'attn' block style (as in PyTorch).
        return self._forward(x, self.params)


# ----------------------------------------------------------------------------
if __name__ == "__main__":
    B, N, C = 2, 16, 128        # dim=128 keeps every lane dim a multiple of 128
    key = jax.random.PRNGKey(0)
    kx, kp, kw = jax.random.split(key, 3)

    x = jax.random.normal(kx, (B, N, C), jnp.float32)
    pos = jax.random.normal(kp, (B, N, 3), jnp.float32)   # unused by 'attn' style

    # q_tile=8 -> grid=(2, 2): exercises the per-batch K/V scratch reuse path.
    block = SelfAttnBlockApiPallas(kw, dim=C, num_heads=4, mlp_ratio=4.0, q_tile=8)
    out = jax.block_until_ready(block(x, pos))
    assert out.shape == (B, N, C)
    assert bool(jnp.all(jnp.isfinite(out)))

    # Validate against the f32 reference (bf16 MXU + approx reciprocal tolerance).
    ref = reference_forward(x, block.raw, num_heads=4)
    err = float(jnp.max(jnp.abs(out - ref)))
    assert err < 5e-2, f"max abs error vs f32 reference: {err}"
    print("KERNEL_OK")
</pallas_src>

<mosaic_0001>
module attributes {stable_mosaic.version = 11 : i64} {
  func.func @kernel(%arg0: i32, %arg1: i32, %arg2: memref<1x16x128xf32, #tpu.memory_space<vmem>>, %arg3: memref<8x128xf32, #tpu.memory_space<vmem>>, %arg4: memref<1x384xf32, #tpu.memory_space<vmem>>, %arg5: memref<1x512xf32, #tpu.memory_space<vmem>>, %arg6: memref<128x384xbf16, #tpu.memory_space<vmem>>, %arg7: memref<128x128xbf16, #tpu.memory_space<vmem>>, %arg8: memref<128x512xbf16, #tpu.memory_space<vmem>>, %arg9: memref<512x128xbf16, #tpu.memory_space<vmem>>, %arg10: memref<1x8x128xf32, #tpu.memory_space<vmem>>, %arg11: memref<2x4x16x32xbf16, #tpu.memory_space<vmem>>) attributes {dimension_semantics = [#tpu.dimension_semantics<parallel>, #tpu.dimension_semantics<arbitrary>], iteration_bounds = array<i64: 2, 2>, scalar_prefetch = 0 : i64, scratch_operands = 1 : i64, tpu.core_type = #tpu.core_type<tc>, window_params = [{transform_indices = @transform_0, window_bounds = array<i64: 1, 16, 128>}, {pipeline_mode = #tpu.pipeline_mode<synchronous>, transform_indices = @transform_1, window_bounds = array<i64: 8, 128>}, {pipeline_mode = #tpu.pipeline_mode<synchronous>, transform_indices = @transform_2, window_bounds = array<i64: 1, 384>}, {pipeline_mode = #tpu.pipeline_mode<synchronous>, transform_indices = @transform_3, window_bounds = array<i64: 1, 512>}, {pipeline_mode = #tpu.pipeline_mode<synchronous>, transform_indices = @transform_4, window_bounds = array<i64: 128, 384>}, {pipeline_mode = #tpu.pipeline_mode<synchronous>, transform_indices = @transform_5, window_bounds = array<i64: 128, 128>}, {pipeline_mode = #tpu.pipeline_mode<synchronous>, transform_indices = @transform_6, window_bounds = array<i64: 128, 512>}, {pipeline_mode = #tpu.pipeline_mode<synchronous>, transform_indices = @transform_7, window_bounds = array<i64: 512, 128>}, {transform_indices = @transform_8, window_bounds = array<i64: 1, 8, 128>}]} {
    %c0_i32 = arith.constant 0 : i32
    %0 = arith.cmpi eq, %arg1, %c0_i32 : i32
    %1 = arith.extui %0 : i1 to i32
    %c0_i32_0 = arith.constant 0 : i32
    %2 = arith.cmpi ne, %1, %c0_i32_0 : i32
    scf.if %2 {
      %c0_48 = arith.constant 0 : index
      %c0_49 = arith.constant 0 : index
      %c0_50 = arith.constant 0 : index
      %113 = vector.load %arg2[%c0_48, %c0_49, %c0_50] : memref<1x16x128xf32, #tpu.memory_space<vmem>>, vector<1x16x128xf32>
      %114 = vector.shape_cast %113 : vector<1x16x128xf32> to vector<16x128xf32>
      %cst_51 = arith.constant dense<0.000000e+00> : vector<16xf32>
      %115 = vector.multi_reduction <add>, %114, %cst_51 [1] : vector<16x128xf32> to vector<16xf32>
      %116 = vector.shape_cast %115 : vector<16xf32> to vector<16x1xf32>
      %cst_52 = arith.constant 1.280000e+02 : f32
      %117 = vector.broadcast %cst_52 : f32 to vector<16x1xf32>
      %118 = arith.divf %116, %117 : vector<16x1xf32>
      %119 = vector.broadcast %118 : vector<16x1xf32> to vector<16x128xf32>
      %120 = arith.subf %114, %119 : vector<16x128xf32>
      %121 = arith.mulf %120, %120 : vector<16x128xf32>
      %cst_53 = arith.constant dense<0.000000e+00> : vector<16xf32>
      %122 = vector.multi_reduction <add>, %121, %cst_53 [1] : vector<16x128xf32> to vector<16xf32>
      %123 = vector.shape_cast %122 : vector<16xf32> to vector<16x1xf32>
      %cst_54 = arith.constant 1.280000e+02 : f32
      %124 = vector.broadcast %cst_54 : f32 to vector<16x1xf32>
      %125 = arith.divf %123, %124 : vector<16x1xf32>
      %cst_55 = arith.constant 9.99999974E-6 : f32
      %126 = vector.broadcast %cst_55 : f32 to vector<16x1xf32>
      %127 = arith.addf %125, %126 : vector<16x1xf32>
      %128 = math.rsqrt %127 : vector<16x1xf32>
      %129 = vector.broadcast %128 : vector<16x1xf32> to vector<16x128xf32>
      %130 = arith.mulf %120, %129 : vector<16x128xf32>
      %131 = arith.truncf %130 : vector<16x128xf32> to vector<16x128xbf16>
      %c0_56 = arith.constant 0 : index
      %c128 = arith.constant 128 : index
      %132 = vector.load %arg6[%c0_56, %c128] : memref<128x384xbf16, #tpu.memory_space<vmem>>, vector<128x256xbf16>
      %cst_57 = arith.constant dense<0.000000e+00> : vector<16x256xf32>
      %133 = tpu.matmul %131, %132, %cst_57 {dimension_numbers = #tpu.dot_dimension_numbers<[1], [0], [0], [1], [0, 0, 1, 1], [], []>} : vector<16x128xbf16>, vector<128x256xbf16>, vector<16x256xf32> -> vector<16x256xf32>
      %c0_58 = arith.constant 0 : index
      %c128_59 = arith.constant 128 : index
      %134 = vector.load %arg4[%c0_58, %c128_59] : memref<1x384xf32, #tpu.memory_space<vmem>>, vector<1x256xf32>
      %135 = vector.broadcast %134 : vector<1x256xf32> to vector<16x256xf32>
      %136 = arith.addf %133, %135 : vector<16x256xf32>
      %137 = arith.truncf %136 : vector<16x256xf32> to vector<16x256xbf16>
      %138 = vector.extract_strided_slice %137 {offsets = [0, 0], sizes = [16, 128], strides = [1, 1]} : vector<16x256xbf16> to vector<16x128xbf16>
      %139 = vector.extract_strided_slice %138 {offsets = [0, 0], sizes = [16, 32], strides = [1, 1]} : vector<16x128xbf16> to vector<16x32xbf16>
      %140 = vector.extract_strided_slice %138 {offsets = [0, 32], sizes = [16, 32], strides = [1, 1]} : vector<16x128xbf16> to vector<16x32xbf16>
      %141 = vector.extract_strided_slice %138 {offsets = [0, 64], sizes = [16, 32], strides = [1, 1]} : vector<16x128xbf16> to vector<16x32xbf16>
      %142 = vector.extract_strided_slice %138 {offsets = [0, 96], sizes = [16, 32], strides = [1, 1]} : vector<16x128xbf16> to vector<16x32xbf16>
      %143 = vector.shape_cast %139 : vector<16x32xbf16> to vector<1x16x32xbf16>
      %144 = vector.shape_cast %140 : vector<16x32xbf16> to vector<1x16x32xbf16>
      %145 = vector.shape_cast %141 : vector<16x32xbf16> to vector<1x16x32xbf16>
      %146 = vector.shape_cast %142 : vector<16x32xbf16> to vector<1x16x32xbf16>
      %147 = tpu.concatenate %143, %144, %145, %146 in 0 : vector<1x16x32xbf16>, vector<1x16x32xbf16>, vector<1x16x32xbf16>, vector<1x16x32xbf16> -> vector<4x16x32xbf16>
      %c0_60 = arith.constant 0 : index
      %c0_61 = arith.constant 0 : index
      %c0_62 = arith.constant 0 : index
      %c0_63 = arith.constant 0 : index
      %148 = vector.load %arg11[%c0_60, %c0_61, %c0_62, %c0_63] : memref<2x4x16x32xbf16, #tpu.memory_space<vmem>>, vector<1x4x16x32xbf16>
      %149 = vector.shape_cast %148 : vector<1x4x16x32xbf16> to vector<4x16x32xbf16>
      %150 = vector.shape_cast %147 : vector<4x16x32xbf16> to vector<1x4x16x32xbf16>
      tpu.vector_store %arg11[%c0_60, %c0_61, %c0_62, %c0_63], %150 {strides = array<i32>} : memref<2x4x16x32xbf16, #tpu.memory_space<vmem>>, vector<1x4x16x32xbf16>,
      %151 = vector.extract_strided_slice %137 {offsets = [0, 128], sizes = [16, 128], strides = [1, 1]} : vector<16x256xbf16> to vector<16x128xbf16>
      %152 = vector.extract_strided_slice %151 {offsets = [0, 0], sizes = [16, 32], strides = [1, 1]} : vector<16x128xbf16> to vector<16x32xbf16>
      %153 = vector.extract_strided_slice %151 {offsets = [0, 32], sizes = [16, 32], strides = [1, 1]} : vector<16x128xbf16> to vector<16x32xbf16>
      %154 = vector.extract_strided_slice %151 {offsets = [0, 64], sizes = [16, 32], strides = [1, 1]} : vector<16x128xbf16> to vector<16x32xbf16>
      %155 = vector.extract_strided_slice %151 {offsets = [0, 96], sizes = [16, 32], strides = [1, 1]} : vector<16x128xbf16> to vector<16x32xbf16>
      %156 = vector.shape_cast %152 : vector<16x32xbf16> to vector<1x16x32xbf16>
      %157 = vector.shape_cast %153 : vector<16x32xbf16> to vector<1x16x32xbf16>
      %158 = vector.shape_cast %154 : vector<16x32xbf16> to vector<1x16x32xbf16>
      %159 = vector.shape_cast %155 : vector<16x32xbf16> to vector<1x16x32xbf16>
      %160 = tpu.concatenate %156, %157, %158, %159 in 0 : vector<1x16x32xbf16>, vector<1x16x32xbf16>, vector<1x16x32xbf16>, vector<1x16x32xbf16> -> vector<4x16x32xbf16>
      %c1_64 = arith.constant 1 : index
      %c0_65 = arith.constant 0 : index
      %c0_66 = arith.constant 0 : index
      %c0_67 = arith.constant 0 : index
      %161 = vector.load %arg11[%c1_64, %c0_65, %c0_66, %c0_67] : memref<2x4x16x32xbf16, #tpu.memory_space<vmem>>, vector<1x4x16x32xbf16>
      %162 = vector.shape_cast %161 : vector<1x4x16x32xbf16> to vector<4x16x32xbf16>
      %163 = vector.shape_cast %160 : vector<4x16x32xbf16> to vector<1x4x16x32xbf16>
      tpu.vector_store %arg11[%c1_64, %c0_65, %c0_66, %c0_67], %163 {strides = array<i32>} : memref<2x4x16x32xbf16, #tpu.memory_space<vmem>>, vector<1x4x16x32xbf16>,
    } else {
    }
    %c8_i32 = arith.constant 8 : i32
    %3 = arith.muli %arg1, %c8_i32 : i32
    %4 = tpu.assume_multiple %3, 8 : i32
    %c0 = arith.constant 0 : index
    %5 = arith.index_cast %4 : i32 to index
    %c0_1 = arith.constant 0 : index
    %6 = vector.load %arg2[%c0, %5, %c0_1] : memref<1x16x128xf32, #tpu.memory_space<vmem>>, vector<1x8x128xf32>
    %7 = vector.shape_cast %6 : vector<1x8x128xf32> to vector<8x128xf32>
    %cst = arith.constant dense<0.000000e+00> : vector<8xf32>
    %8 = vector.multi_reduction <add>, %7, %cst [1] : vector<8x128xf32> to vector<8xf32>
    %9 = vector.shape_cast %8 : vector<8xf32> to vector<8x1xf32>
    %cst_2 = arith.constant 1.280000e+02 : f32
    %10 = vector.broadcast %cst_2 : f32 to vector<8x1xf32>
    %11 = arith.divf %9, %10 : vector<8x1xf32>
    %12 = vector.broadcast %11 : vector<8x1xf32> to vector<8x128xf32>
    %13 = arith.subf %7, %12 : vector<8x128xf32>
    %14 = arith.mulf %13, %13 : vector<8x128xf32>
    %cst_3 = arith.constant dense<0.000000e+00> : vector<8xf32>
    %15 = vector.multi_reduction <add>, %14, %cst_3 [1] : vector<8x128xf32> to vector<8xf32>
    %16 = vector.shape_cast %15 : vector<8xf32> to vector<8x1xf32>
    %cst_4 = arith.constant 1.280000e+02 : f32
    %17 = vector.broadcast %cst_4 : f32 to vector<8x1xf32>
    %18 = arith.divf %16, %17 : vector<8x1xf32>
    %cst_5 = arith.constant 9.99999974E-6 : f32
    %19 = vector.broadcast %cst_5 : f32 to vector<8x1xf32>
    %20 = arith.addf %18, %19 : vector<8x1xf32>
    %21 = math.rsqrt %20 : vector<8x1xf32>
    %22 = vector.broadcast %21 : vector<8x1xf32> to vector<8x128xf32>
    %23 = arith.mulf %13, %22 : vector<8x128xf32>
    %24 = arith.truncf %23 : vector<8x128xf32> to vector<8x128xbf16>
    %c0_6 = arith.constant 0 : index
    %c0_7 = arith.constant 0 : index
    %25 = vector.load %arg6[%c0_6, %c0_7] : memref<128x384xbf16, #tpu.memory_space<vmem>>, vector<128x128xbf16>
    %cst_8 = arith.constant dense<0.000000e+00> : vector<8x128xf32>
    %26 = tpu.matmul %24, %25, %cst_8 {dimension_numbers = #tpu.dot_dimension_numbers<[1], [0], [0], [1], [0, 0, 1, 1], [], []>} : vector<8x128xbf16>, vector<128x128xbf16>, vector<8x128xf32> -> vector<8x128xf32>
    %c0_9 = arith.constant 0 : index
    %c0_10 = arith.constant 0 : index
    %27 = vector.load %arg4[%c0_9, %c0_10] : memref<1x384xf32, #tpu.memory_space<vmem>>, vector<1x128xf32>
    %28 = vector.broadcast %27 : vector<1x128xf32> to vector<8x128xf32>
    %29 = arith.addf %26, %28 : vector<8x128xf32>
    %30 = arith.truncf %29 : vector<8x128xf32> to vector<8x128xbf16>
    %31 = vector.extract_strided_slice %30 {offsets = [0, 0], sizes = [8, 32], strides = [1, 1]} : vector<8x128xbf16> to vector<8x32xbf16>
    %32 = vector.extract_strided_slice %30 {offsets = [0, 32], sizes = [8, 32], strides = [1, 1]} : vector<8x128xbf16> to vector<8x32xbf16>
    %33 = vector.extract_strided_slice %30 {offsets = [0, 64], sizes = [8, 32], strides = [1, 1]} : vector<8x128xbf16> to vector<8x32xbf16>
    %34 = vector.extract_strided_slice %30 {offsets = [0, 96], sizes = [8, 32], strides = [1, 1]} : vector<8x128xbf16> to vector<8x32xbf16>
    %35 = vector.shape_cast %31 : vector<8x32xbf16> to vector<1x8x32xbf16>
    %36 = vector.shape_cast %32 : vector<8x32xbf16> to vector<1x8x32xbf16>
    %37 = vector.shape_cast %33 : vector<8x32xbf16> to vector<1x8x32xbf16>
    %38 = vector.shape_cast %34 : vector<8x32xbf16> to vector<1x8x32xbf16>
    %39 = tpu.concatenate %35, %36, %37, %38 in 0 : vector<1x8x32xbf16>, vector<1x8x32xbf16>, vector<1x8x32xbf16>, vector<1x8x32xbf16> -> vector<4x8x32xbf16>
    %c0_11 = arith.constant 0 : index
    %c0_12 = arith.constant 0 : index
    %c0_13 = arith.constant 0 : index
    %c0_14 = arith.constant 0 : index
    %40 = vector.load %arg11[%c0_11, %c0_12, %c0_13, %c0_14] : memref<2x4x16x32xbf16, #tpu.memory_space<vmem>>, vector<1x4x16x32xbf16>
    %41 = vector.shape_cast %40 : vector<1x4x16x32xbf16> to vector<4x16x32xbf16>
    %c1 = arith.constant 1 : index
    %c0_15 = arith.constant 0 : index
    %c0_16 = arith.constant 0 : index
    %c0_17 = arith.constant 0 : index
    %42 = vector.load %arg11[%c1, %c0_15, %c0_16, %c0_17] : memref<2x4x16x32xbf16, #tpu.memory_space<vmem>>, vector<1x4x16x32xbf16>
    %43 = vector.shape_cast %42 : vector<1x4x16x32xbf16> to vector<4x16x32xbf16>
    "tpu.trace_start"() <{level = 10 : i32, message = "hqd,hkd->hqk"}> : () -> ()
    %cst_18 = arith.constant dense<0.000000e+00> : vector<4x8x16xf32>
    %44 = tpu.matmul %39, %41, %cst_18 {dimension_numbers = #tpu.dot_dimension_numbers<[2], [2], [1], [1], [0, 0, 0, 1, 1, 1], [0], [0]>} : vector<4x8x32xbf16>, vector<4x16x32xbf16>, vector<4x8x16xf32> -> vector<4x8x16xf32>
    "tpu.trace_stop"() : () -> ()
    %cst_19 = arith.constant dense<0xFF800000> : vector<4x8xf32>
    %45 = vector.multi_reduction <maximumf>, %44, %cst_19 [2] : vector<4x8x16xf32> to vector<4x8xf32>
    %46 = vector.shape_cast %45 : vector<4x8xf32> to vector<4x8x1xf32>
    %47 = vector.broadcast %46 : vector<4x8x1xf32> to vector<4x8x16xf32>
    %48 = arith.subf %44, %47 : vector<4x8x16xf32>
    %49 = math.exp %48 : vector<4x8x16xf32>
    %cst_20 = arith.constant dense<0.000000e+00> : vector<4x8xf32>
    %50 = vector.multi_reduction <add>, %49, %cst_20 [2] : vector<4x8x16xf32> to vector<4x8xf32>
    %51 = vector.shape_cast %50 : vector<4x8xf32> to vector<4x8x1xf32>
    %52 = tpu.reciprocal %51 {approx = true} : vector<4x8x1xf32> -> vector<4x8x1xf32>
    %53 = vector.broadcast %52 : vector<4x8x1xf32> to vector<4x8x16xf32>
    %54 = arith.mulf %49, %53 : vector<4x8x16xf32>
    %55 = arith.truncf %54 : vector<4x8x16xf32> to vector<4x8x16xbf16>
    "tpu.trace_start"() <{level = 10 : i32, message = "hqk,hkd->hqd"}> : () -> ()
    %cst_21 = arith.constant dense<0.000000e+00> : vector<4x8x32xf32>
    %56 = tpu.matmul %55, %43, %cst_21 {dimension_numbers = #tpu.dot_dimension_numbers<[2], [1], [1], [2], [0, 0, 0, 1, 1, 2], [0], [0]>} : vector<4x8x16xbf16>, vector<4x16x32xbf16>, vector<4x8x32xf32> -> vector<4x8x32xf32>
    "tpu.trace_stop"() : () -> ()
    %57 = vector.extract_strided_slice %56 {offsets = [0, 0, 0], sizes = [1, 8, 32], strides = [1, 1, 1]} : vector<4x8x32xf32> to vector<1x8x32xf32>
    %58 = vector.shape_cast %57 : vector<1x8x32xf32> to vector<8x32xf32>
    %59 = vector.extract_strided_slice %56 {offsets = [1, 0, 0], sizes = [1, 8, 32], strides = [1, 1, 1]} : vector<4x8x32xf32> to vector<1x8x32xf32>
    %60 = vector.shape_cast %59 : vector<1x8x32xf32> to vector<8x32xf32>
    %61 = vector.extract_strided_slice %56 {offsets = [2, 0, 0], sizes = [1, 8, 32], strides = [1, 1, 1]} : vector<4x8x32xf32> to vector<1x8x32xf32>
    %62 = vector.shape_cast %61 : vector<1x8x32xf32> to vector<8x32xf32>
    %63 = vector.extract_strided_slice %56 {offsets = [3, 0, 0], sizes = [1, 8, 32], strides = [1, 1, 1]} : vector<4x8x32xf32> to vector<1x8x32xf32>
    %64 = vector.shape_cast %63 : vector<1x8x32xf32> to vector<8x32xf32>
    %65 = tpu.concatenate %58, %60, %62, %64 in 1 : vector<8x32xf32>, vector<8x32xf32>, vector<8x32xf32>, vector<8x32xf32> -> vector<8x128xf32>
    %66 = arith.truncf %65 : vector<8x128xf32> to vector<8x128xbf16>
    %c0_22 = arith.constant 0 : index
    %c0_23 = arith.constant 0 : index
    %67 = vector.load %arg7[%c0_22, %c0_23] : memref<128x128xbf16, #tpu.memory_space<vmem>>, vector<128x128xbf16>
    %cst_24 = arith.constant dense<0.000000e+00> : vector<8x128xf32>
    %68 = tpu.matmul %66, %67, %cst_24 {dimension_numbers = #tpu.dot_dimension_numbers<[1], [0], [0], [1], [0, 0, 1, 1], [], []>} : vector<8x128xbf16>, vector<128x128xbf16>, vector<8x128xf32> -> vector<8x128xf32>
    %c0_25 = arith.constant 0 : index
    %c0_26 = arith.constant 0 : index
    %69 = vector.load %arg3[%c0_25, %c0_26] : memref<8x128xf32, #tpu.memory_space<vmem>>, vector<1x128xf32>
    %70 = vector.broadcast %69 : vector<1x128xf32> to vector<8x128xf32>
    %71 = arith.addf %68, %70 : vector<8x128xf32>
    %72 = arith.addf %7, %71 : vector<8x128xf32>
    %cst_27 = arith.constant dense<0.000000e+00> : vector<8xf32>
    %73 = vector.multi_reduction <add>, %72, %cst_27 [1] : vector<8x128xf32> to vector<8xf32>
    %74 = vector.shape_cast %73 : vector<8xf32> to vector<8x1xf32>
    %cst_28 = arith.constant 1.280000e+02 : f32
    %75 = vector.broadcast %cst_28 : f32 to vector<8x1xf32>
    %76 = arith.divf %74, %75 : vector<8x1xf32>
    %77 = vector.broadcast %76 : vector<8x1xf32> to vector<8x128xf32>
    %78 = arith.subf %72, %77 : vector<8x128xf32>
    %79 = arith.mulf %78, %78 : vector<8x128xf32>
    %cst_29 = arith.constant dense<0.000000e+00> : vector<8xf32>
    %80 = vector.multi_reduction <add>, %79, %cst_29 [1] : vector<8x128xf32> to vector<8xf32>
    %81 = vector.shape_cast %80 : vector<8xf32> to vector<8x1xf32>
    %cst_30 = arith.constant 1.280000e+02 : f32
    %82 = vector.broadcast %cst_30 : f32 to vector<8x1xf32>
    %83 = arith.divf %81, %82 : vector<8x1xf32>
    %cst_31 = arith.constant 9.99999974E-6 : f32
    %84 = vector.broadcast %cst_31 : f32 to vector<8x1xf32>
    %85 = arith.addf %83, %84 : vector<8x1xf32>
    %86 = math.rsqrt %85 : vector<8x1xf32>
    %87 = vector.broadcast %86 : vector<8x1xf32> to vector<8x128xf32>
    %88 = arith.mulf %78, %87 : vector<8x128xf32>
    %89 = arith.truncf %88 : vector<8x128xf32> to vector<8x128xbf16>
    %c0_32 = arith.constant 0 : index
    %c0_33 = arith.constant 0 : index
    %90 = vector.load %arg8[%c0_32, %c0_33] : memref<128x512xbf16, #tpu.memory_space<vmem>>, vector<128x512xbf16>
    %cst_34 = arith.constant dense<0.000000e+00> : vector<8x512xf32>
    %91 = tpu.matmul %89, %90, %cst_34 {dimension_numbers = #tpu.dot_dimension_numbers<[1], [0], [0], [1], [0, 0, 1, 1], [], []>} : vector<8x128xbf16>, vector<128x512xbf16>, vector<8x512xf32> -> vector<8x512xf32>
    %c0_35 = arith.constant 0 : index
    %c0_36 = arith.constant 0 : index
    %92 = vector.load %arg5[%c0_35, %c0_36] : memref<1x512xf32, #tpu.memory_space<vmem>>, vector<1x512xf32>
    %93 = vector.broadcast %92 : vector<1x512xf32> to vector<8x512xf32>
    %94 = arith.addf %91, %93 : vector<8x512xf32>
    %cst_37 = arith.constant 5.000000e-01 : f32
    %95 = vector.broadcast %cst_37 : f32 to vector<8x512xf32>
    %96 = arith.mulf %95, %94 : vector<8x512xf32>
    %cst_38 = arith.constant 0.707106769 : f32
    %97 = vector.broadcast %cst_38 : f32 to vector<8x512xf32>
    %98 = arith.mulf %94, %97 : vector<8x512xf32>
    %99 = math.erf %98 : vector<8x512xf32>
    %cst_39 = arith.constant 1.000000e+00 : f32
    %100 = vector.broadcast %cst_39 : f32 to vector<8x512xf32>
    %101 = arith.addf %100, %99 : vector<8x512xf32>
    %102 = arith.mulf %96, %101 : vector<8x512xf32>
    %103 = arith.truncf %102 : vector<8x512xf32> to vector<8x512xbf16>
    %c0_40 = arith.constant 0 : index
    %c0_41 = arith.constant 0 : index
    %104 = vector.load %arg9[%c0_40, %c0_41] : memref<512x128xbf16, #tpu.memory_space<vmem>>, vector<512x128xbf16>
    %cst_42 = arith.constant dense<0.000000e+00> : vector<8x128xf32>
    %105 = tpu.matmul %103, %104, %cst_42 {dimension_numbers = #tpu.dot_dimension_numbers<[1], [0], [0], [1], [0, 0, 1, 1], [], []>} : vector<8x512xbf16>, vector<512x128xbf16>, vector<8x128xf32> -> vector<8x128xf32>
    %c1_43 = arith.constant 1 : index
    %c0_44 = arith.constant 0 : index
    %106 = vector.load %arg3[%c1_43, %c0_44] : memref<8x128xf32, #tpu.memory_space<vmem>>, vector<1x128xf32>
    %107 = vector.broadcast %106 : vector<1x128xf32> to vector<8x128xf32>
    %108 = arith.addf %105, %107 : vector<8x128xf32>
    %109 = arith.addf %72, %108 : vector<8x128xf32>
    %c0_45 = arith.constant 0 : index
    %c0_46 = arith.constant 0 : index
    %c0_47 = arith.constant 0 : index
    %110 = vector.load %arg10[%c0_45, %c0_46, %c0_47] : memref<1x8x128xf32, #tpu.memory_space<vmem>>, vector<1x8x128xf32>
    %111 = vector.shape_cast %110 : vector<1x8x128xf32> to vector<8x128xf32>
    %112 = vector.shape_cast %109 : vector<8x128xf32> to vector<1x8x128xf32>
    tpu.vector_store %arg10[%c0_45, %c0_46, %c0_47], %112 {strides = array<i32>} : memref<1x8x128xf32, #tpu.memory_space<vmem>>, vector<1x8x128xf32>,
    return
  }
  func.func @transform_0(%arg0: i32, %arg1: i32) -> (i32, i32, i32) {
    %c0_i32 = arith.constant 0 : i32
    %c0_i32_0 = arith.constant 0 : i32
    %c0_i32_1 = arith.constant 0 : i32
    return %arg0, %c0_i32, %c0_i32_0 : i32, i32, i32
  }
  func.func @transform_1(%arg0: i32, %arg1: i32) -> (i32, i32) {
    %c0_i32 = arith.constant 0 : i32
    %c0_i32_0 = arith.constant 0 : i32
    %c0_i32_1 = arith.constant 0 : i32
    return %c0_i32, %c0_i32_0 : i32, i32
  }
  func.func @transform_2(%arg0: i32, %arg1: i32) -> (i32, i32) {
    %c0_i32 = arith.constant 0 : i32
    %c0_i32_0 = arith.constant 0 : i32
    %c0_i32_1 = arith.constant 0 : i32
    return %c0_i32, %c0_i32_0 : i32, i32
  }
  func.func @transform_3(%arg0: i32, %arg1: i32) -> (i32, i32) {
    %c0_i32 = arith.constant 0 : i32
    %c0_i32_0 = arith.constant 0 : i32
    %c0_i32_1 = arith.constant 0 : i32
    return %c0_i32, %c0_i32_0 : i32, i32
  }
  func.func @transform_4(%arg0: i32, %arg1: i32) -> (i32, i32) {
    %c0_i32 = arith.constant 0 : i32
    %c0_i32_0 = arith.constant 0 : i32
    %c0_i32_1 = arith.constant 0 : i32
    return %c0_i32, %c0_i32_0 : i32, i32
  }
  func.func @transform_5(%arg0: i32, %arg1: i32) -> (i32, i32) {
    %c0_i32 = arith.constant 0 : i32
    %c0_i32_0 = arith.constant 0 : i32
    %c0_i32_1 = arith.constant 0 : i32
    return %c0_i32, %c0_i32_0 : i32, i32
  }
  func.func @transform_6(%arg0: i32, %arg1: i32) -> (i32, i32) {
    %c0_i32 = arith.constant 0 : i32
    %c0_i32_0 = arith.constant 0 : i32
    %c0_i32_1 = arith.constant 0 : i32
    return %c0_i32, %c0_i32_0 : i32, i32
  }
  func.func @transform_7(%arg0: i32, %arg1: i32) -> (i32, i32) {
    %c0_i32 = arith.constant 0 : i32
    %c0_i32_0 = arith.constant 0 : i32
    %c0_i32_1 = arith.constant 0 : i32
    return %c0_i32, %c0_i32_0 : i32, i32
  }
  func.func @transform_8(%arg0: i32, %arg1: i32) -> (i32, i32, i32) {
    %c0_i32 = arith.constant 0 : i32
    %c0_i32_0 = arith.constant 0 : i32
    return %arg0, %arg1, %c0_i32 : i32, i32, i32
  }
}

</mosaic_0001>

<bundles_post_ra>
// kernel: run_block.1
= control target key start
LH: loop header
LB: loop body
LE: loop exit
PB: predicated region body
PF: predicated region fallthrough
CT: control target
= control target key end

     0   :  { %s3614_s0 = inlined_call_operand.hbm [shape: f32[2,16,128], index: 0, kind: input, shape index: {}]   ;;  %s3615_s1 = inlined_call_operand.vmem [shape: f32[8,128], index: 1, kind: input, shape index: {}]   ;;  %s3616_s2 = inlined_call_operand.vmem [shape: f32[1,384], index: 2, kind: input, shape index: {}]   ;;  %s3617_s3 = inlined_call_operand.hbm [shape: f32[1,512], index: 3, kind: input, shape index: {}]   ;;  %s3618_s4 = inlined_call_operand.hbm [shape: bf16[128,384], index: 4, kind: input, shape index: {}]   ;;  %s3619_s5 = inlined_call_operand.hbm [shape: bf16[128,128], index: 5, kind: input, shape index: {}]   ;;  %s3620_s6 = inlined_call_operand.hbm [shape: bf16[128,512], index: 6, kind: input, shape index: {}]   ;;  %s3621_s7 = inlined_call_operand.hbm [shape: bf16[512,128], index: 7, kind: input, shape index: {}]   ;;  %s3622_s8 = inlined_call_operand.hbm [shape: f32[2,16,128], index: 8, kind: output, shape index: {}]  }
   0x1   :  { %3633 = sst [smem:[#allocation23_spill]] %s3615_s1 }
   0x2   :  { %3634 = sst [smem:[#allocation24_spill]] %s3616_s2 }
   0x3   :  { %3635 = sst [smem:[#allocation25_spill]] %s3617_s3 }
   0x4   :  { %3636 = sst [smem:[#allocation26_spill]] %s3618_s4 }
   0x5   :  { %3637 = sst [smem:[#allocation27_spill]] %s3619_s5 }
   0x6   :  { %3638 = sst [smem:[#allocation28_spill]] %s3620_s6 }
   0x7   :  { %3639 = sst [smem:[#allocation29_spill]] %s3622_s8 }
   0x8   :  { %13 = vsyncpa [#allocation4], 0 }
   0x9   :  { %15 = vsyncpa [#allocation4 + $0x1], 0 }
   0xa   :  { %16 = vsyncpa [#allocation7], 0 }
   0xb   :  { %17 = vsyncpa [#allocation10], 0 }
   0xc   :  { %18 = vsyncpa [#allocation13], 0 }
   0xd   :  { %19 = vsyncpa [#allocation5], 0 }
   0xe   :  { %21 = vsyncpa [#allocation5 + $0x1], 0  ;;  %s3125_s27 = smov 0   ;;  %s3127_s28 = smov 0  }
   0xf   :  { %s3129_s29 = smov 0   ;;  %s3131_s30 = smov 0  }
  0x10   :  { %s3133_s9 = smov 0   ;;  %s3135_s10 = smov 0  }
  0x11   :  { %s3137_s11 = smov 0   ;;  %s3139_s12 = smov 0  }
  0x12   :  { %s3141_s13 = smov 0   ;;  %s3143_s14 = smov 0  }
  0x13   :  { %s3145_s15 = smov 0  }
  0x14 LB: > { %3640 = sst [smem:[#allocation20_spill]] %s3037_s11  ;;  %s2125_s16 = sadd.s32 4294967295, %s3053_s15   ;;  %s3053_s15 = sphi %s3145_s15, %s27_s15   ;;  %s3049_s14 = sphi %s3143_s14, %s3683_s14   ;;  %s3045_s13 = sphi %s3141_s13, %s3682_s13   ;;  %s3041_s12 = sphi %s3139_s12, %s3681_s12   ;;  %s3037_s11 = sphi %s3137_s11, %s3680_s11   ;;  %s3033_s10 = sphi %s3135_s10, %s3679_s10   ;;  %s3029_s9 = sphi %s3133_s9, %s3678_s9   ;;  %s3025_s30 = sphi %s3131_s30, %s3677_s30   ;;  %s3021_s29 = sphi %s3129_s29, %s3676_s29   ;;  %s3017_s28 = sphi %s3127_s28, %s3675_s28   ;;  %s3013_s27 = sphi %s3125_s27, %s3674_s27  }
  0x15   : > { %3641 = sst [smem:[#allocation21_spill]] %s3041_s12  ;;  %p2127_p0 = scmp.ge.s32.totalorder %s3053_s15, 1 }
  0x16   : > { %p3182_p1 = scmp.eq.s32.totalorder %s2125_s16, 0  ;;  %p3186_p2 = scmp.eq.s32.totalorder %s2125_s16, 3 }
  0x17   : > { %p245_p3 = scmp.lt.s32.totalorder %s3053_s15, 5  ;;  %s3055_s20 = smov [#allocation6]  }
  0x18   : > { %s3642_s17 = scalar_select %p3182_p1, 1, 0 }
  0x19   : > { %s3643_s18 = scalar_select %p3186_p2, 1, 0 }
  0x1a   : > { %p3191_p4 = pnand %p2127_p0, %p245_p3  ;;  %s264_s21 = sshll.u32 %s3055_s20, 4  ;;  %s265_s21 = int_to_ptr.vmem [resolvable:$true] %s264_s21 }
  0x1b   : > { %s3056_s22 = smov [#allocation9]   ;;  %s3057_s25 = smov [#allocation8]  }
  0x1c   : > { %s3644_s19 = scalar_select %p3191_p4, 1, 0 }
  0x1d   : > { %p2450_p5 = pneg %p3191_p4  ;;  %s287_s23 = sshll.u32 %s3056_s22, 4  ;;  %s3197_s23 = int_to_ptr.vmem [resolvable:$true] %s287_s23 }
  0x1e   : > { %3645 = sst [smem:[#allocation22_spill]] %s3644_s19  ;;  %s3205_s26 = sshll.u32 %s3057_s25, 4  ;;  %s275_s26 = int_to_ptr.vmem [resolvable:$true] %s3205_s26 }
  0x1f   : > { %p3201_p6 = pnand %p2450_p5, %p3182_p1  ;;  %s3647_s3 = sld [smem:[#allocation25_spill]] }
  0x21   : > { %p3215_p8 = pneg %p3201_p6 }
  0x25   : > { %s2749_s20 = scalar_lea.hbm %s3647_s3, 64 }
  0x26   : > { %p2750_p7 = scmp.ne.s32.totalorder %s3647_s3, %s2749_s20  ;;  %p2756_p11 = scmp.lt.u32.totalorder %s2749_s20, %s3647_s3 }
  0x28   : > { %p2752_p9 = pnand %p3215_p8, %p2750_p7 }
  0x2a   : > { %p2753_p10 = pneg %p2752_p9 }
  0x2c   : > { %p2758_p12 = pnand %p2756_p11, %p2753_p10 }
  0x2e   : > { %2761 = shalt.err (!%p2758_p12)
}
  0x2f   : > { %s2762_s8 = scalar_lea.vmem %s265_s21, 64  ;;  %p2770_p5 = scmp.lt.s32.totalorder %s265_s21, %s265_s21 }
  0x30   : > { %p2763_p13 = scmp.ne.s32.totalorder %s265_s21, %s2762_s8  ;;  %p2771_p4 = scmp.lt.s32.totalorder %s2762_s8, %s2762_s8 }
  0x32   : > { %p2765_p0 = pnand %p2763_p13, %p3215_p8  ;;  %p2772_p2 = por %p2771_p4, %p2770_p5 }
  0x34   : > { %p2766_p3 = pneg %p2765_p0 }
  0x36   : > { %p2773_p1 = pnand %p2772_p2, %p2766_p3 }
  0x38   : > { %2776 = shalt.err (!%p2773_p1)
}
  0x39   : > { %2453 = dma.hbm_to_vmem [thread:$0]  (!%p3201_p6), %s3647_s3, 64, %s265_s21, [#allocation7]  }
  0x3a   : > { %s3649_s5 = sld [smem:[#allocation27_spill]] }
  0x40   : > { %s2777_s20 = scalar_lea.hbm %s3649_s5, 1024 }
  0x41   : > { %p2778_p7 = scmp.ne.s32.totalorder %s3649_s5, %s2777_s20  ;;  %p2784_p1 = scmp.lt.u32.totalorder %s2777_s20, %s3649_s5 }
  0x43   : > { %p2780_p9 = pnand %p2778_p7, %p3215_p8 }
  0x45   : > { %p2781_p4 = pneg %p2780_p9 }
  0x47   : > { %p2786_p2 = pnand %p2784_p1, %p2781_p4 }
  0x49   : > { %2789 = shalt.err (!%p2786_p2)
}
  0x4a   : > { %s2790_s21 = scalar_lea.vmem %s3197_s23, 1024  ;;  %p2798_p13 = scmp.lt.s32.totalorder %s3197_s23, %s3197_s23 }
  0x4b   : > { %p2791_p10 = scmp.ne.s32.totalorder %s3197_s23, %s2790_s21  ;;  %p2799_p0 = scmp.lt.s32.totalorder %s2790_s21, %s2790_s21 }
  0x4d   : > { %p2793_p11 = pnand %p2791_p10, %p3215_p8  ;;  %p2800_p3 = por %p2799_p0, %p2798_p13 }
  0x4f   : > { %p2794_p12 = pneg %p2793_p11 }
  0x51   : > { %p2801_p5 = pnand %p2800_p3, %p2794_p12 }
  0x53   : > { %2804 = shalt.err (!%p2801_p5)
}
  0x54   : > { %s3630_s11 = smov 64   ;;  %s3631_s19 = smov 4  }
  0x55   : > { %2459 = dma.hbm_to_vmem [thread:$0]  (!%p3201_p6), %s3649_s5, 1024, %s3197_s23, [#allocation10], %s3630_s11, %s3630_s11, %s3631_s19  }
  0x56   : > { %s3650_s4 = sld [smem:[#allocation26_spill]] }
  0x5c   : > { %s2805_s20 = scalar_lea.hbm %s3650_s4, 3072 }
  0x5d   : > { %p2806_p7 = scmp.ne.s32.totalorder %s3650_s4, %s2805_s20  ;;  %p2812_p1 = scmp.lt.u32.totalorder %s2805_s20, %s3650_s4 }
  0x5f   : > { %p2808_p9 = pnand %p2806_p7, %p3215_p8 }
  0x61   : > { %p2809_p4 = pneg %p2808_p9 }
  0x63   : > { %p2814_p2 = pnand %p2812_p1, %p2809_p4 }
  0x65   : > { %2817 = shalt.err (!%p2814_p2)
}
  0x66   : > { %s2818_s1 = scalar_lea.vmem %s275_s26, 3072  ;;  %p2826_p13 = scmp.lt.s32.totalorder %s275_s26, %s275_s26 }
  0x67   : > { %p2819_p10 = scmp.ne.s32.totalorder %s275_s26, %s2818_s1  ;;  %p2827_p0 = scmp.lt.s32.totalorder %s2818_s1, %s2818_s1 }
  0x69   : > { %p2821_p11 = pnand %p2819_p10, %p3215_p8  ;;  %p2828_p3 = por %p2827_p0, %p2826_p13 }
  0x6b   : > { %p2822_p12 = pneg %p2821_p11 }
  0x6d   : > { %p2829_p5 = pnand %p2828_p3, %p2822_p12 }
  0x6f   : > { %2832 = shalt.err (!%p2829_p5)
}
  0x70   : > { %s3060_s23 = smov 192   ;;  %s3061_s12 = smov 12  }
  0x71   : > { %2456 = dma.hbm_to_vmem [thread:$0]  (!%p3201_p6), %s3650_s4, 3072, %s275_s26, [#allocation7], %s3060_s23, %s3060_s23, %s3061_s12  }
  0x72   : > { %s3062_s16 = smov [#allocation11]   ;;  %s3651_s6 = sld [smem:[#allocation28_spill]] }
  0x73   : > { %s300_s20 = sshll.u32 %s3062_s16, 4  ;;  %s301_s20 = int_to_ptr.vmem [resolvable:$true] %s300_s20 }
  0x78   : > { %s2833_s21 = scalar_lea.hbm %s3651_s6, 4096 }
  0x79   : > { %p2834_p7 = scmp.ne.s32.totalorder %s3651_s6, %s2833_s21  ;;  %p2840_p1 = scmp.lt.u32.totalorder %s2833_s21, %s3651_s6 }
  0x7b   : > { %p2836_p9 = pnand %p2834_p7, %p3215_p8 }
  0x7d   : > { %p2837_p4 = pneg %p2836_p9 }
  0x7f   : > { %p2842_p2 = pnand %p2840_p1, %p2837_p4 }
  0x81   : > { %2845 = shalt.err (!%p2842_p2)
}
  0x82   : > { %s2846_s26 = scalar_lea.vmem %s301_s20, 4096  ;;  %p2854_p13 = scmp.lt.s32.totalorder %s301_s20, %s301_s20 }
  0x83   : > { %p2847_p10 = scmp.ne.s32.totalorder %s301_s20, %s2846_s26  ;;  %p2855_p0 = scmp.lt.s32.totalorder %s2846_s26, %s2846_s26 }
  0x85   : > { %p2849_p11 = pnand %p2847_p10, %p3215_p8  ;;  %p2856_p3 = por %p2855_p0, %p2854_p13 }
  0x87   : > { %p2850_p12 = pneg %p2849_p11 }
  0x89   : > { %p2857_p5 = pnand %p2856_p3, %p2850_p12 }
  0x8b   : > { %2860 = shalt.err (!%p2857_p5)
}
  0x8c   : > { %s3063_s11 = smov 256   ;;  %s3064_s23 = smov 16  }
  0x8d   : > { %2462 = dma.hbm_to_vmem [thread:$0]  (!%p3201_p6), %s3651_s6, 4096, %s301_s20, [#allocation10], %s3063_s11, %s3063_s11, %s3064_s23  }
  0x8e   : > { %s3065_s12 = smov [#allocation12]   ;;  %s2861_s25 = scalar_lea.hbm %s3621_s7, 4096 }
  0x8f   : > { %s313_s3 = sshll.u32 %s3065_s12, 4  ;;  %p2862_p7 = scmp.ne.s32.totalorder %s3621_s7, %s2861_s25  ;;  %s314_s3 = int_to_ptr.vmem [resolvable:$true] %s313_s3 }
  0x90   : > { %p2868_p1 = scmp.lt.u32.totalorder %s2861_s25, %s3621_s7 }
  0x91   : > { %p2864_p9 = pnand %p2862_p7, %p3215_p8 }
  0x93   : > { %p2865_p4 = pneg %p2864_p9 }
  0x95   : > { %p2870_p2 = pnand %p2868_p1, %p2865_p4 }
  0x97   : > { %2873 = shalt.err (!%p2870_p2)
}
  0x98   : > { %s2874_s20 = scalar_lea.vmem %s314_s3, 4096  ;;  %p2882_p13 = scmp.lt.s32.totalorder %s314_s3, %s314_s3 }
  0x99   : > { %p2875_p10 = scmp.ne.s32.totalorder %s314_s3, %s2874_s20  ;;  %p2883_p0 = scmp.lt.s32.totalorder %s2874_s20, %s2874_s20 }
  0x9b   : > { %p2877_p11 = pnand %p2875_p10, %p3215_p8  ;;  %p2884_p3 = por %p2883_p0, %p2882_p13 }
  0x9d   : > { %p2878_p12 = pneg %p2877_p11 }
  0x9f   : > { %p2885_p5 = pnand %p2884_p3, %p2878_p12 }
  0xa1   : > { %2888 = shalt.err (!%p2885_p5)
}
  0xa2   : > { %s3652_s11 = smov 4   ;;  %s3653_s23 = smov 64  }
  0xa3   : > { %2465 = dma.hbm_to_vmem [thread:$0]  (!%p3201_p6), %s3621_s7, 4096, %s314_s3, [#allocation13], %s3653_s23, %s3653_s23, %s3652_s11  }
  0xa4   : > { %s2126_s24 = sadd.s32 4294967294, %s3053_s15   ;;  %s36_s22 = sadd.s32 1, %s3045_s13 }
  0xa5   : > { %p37_p8 = scmp.ge.s32.totalorder %s36_s22, 2  ;;  %s39_s12 = sadd.s32 1, %s3049_s14 }
  0xa6   : > { %s46_s2 = sadd.s32 1, %s3033_s10  ;;  %p53_p7 = scmp.ne.s32.totalorder %s3033_s10, %s3029_s9 }
  0xa7   : > { %s3685_s22 = smov (%p37_p8, %s36_s22), 0  ;;  %s3687_s12 = smov (!%p37_p8, %s39_s12), %s3049_s14 }
  0xa8   : > { %p54_p9 = scmp.eq.s32.totalorder %s3053_s15, 0  ;;  %p59_p6 = scmp.ne.s32.totalorder %s3029_s9, %s3025_s30 }
  0xa9   : > { %p41_p4 = scmp.ge.s32.totalorder %s3687_s12, 2  ;;  %s217_s3 = ssub.s32 %s3045_s13, %s3685_s22 }
  0xaa   : > { %p3329_p1 = por %p54_p9, %p53_p7  ;;  %p3655_p2 = scmp.ne.s32.totalorder %s3642_s17, 0 }
  0xab   : > { %s3689_s12 = smov (%p41_p4, %s3687_s12), 0  ;;  %s221_s8 = sadd.s32 1, %s3021_s29 }
  0xac   : > { %p3335_p10 = por %p3655_p2, %p59_p6  ;;  %p231_p11 = scmp.ne.s32.totalorder %s3021_s29, %s3017_s28 }
  0xad   : > { %s43_s30 = ssub.s32 %s3049_s14, %s3689_s12  ;;  %p237_p12 = scmp.ne.s32.totalorder %s3017_s28, %s3013_s27 }
  0xae   : > { %p44_p13 = scmp.eq.s32.totalorder %s43_s30, 0  ;;  %s218_s21 = sor.u32 %s217_s3, %s43_s30 }
  0xaf   : > { %p219_p0 = scmp.eq.s32.totalorder %s218_s21, 0  ;;  %p3657_p3 = scmp.ne.s32.totalorder %s3643_s18, 0 }
  0xb0   : > { %s3355_s26 = scalar_select %p44_p13, %s3033_s10, %s46_s2  }
  0xb1   : > { %p3350_p5 = por %p3657_p3, %p231_p11  ;;  %p238_p8 = scmp.eq.s32.totalorder %s2126_s24, 3 }
  0xb2   : > { %s3358_s20 = scalar_select %p219_p0, %s3021_s29, %s221_s8  }
  0xb3   : > { %s3658_s1 = scalar_select %p3350_p5, 1, 0 }
  0xb4   : > { %p2479_p7 = scmp.lt.s32.totalorder %s3053_s15, 4  ;;  %s327_s11 = sand.u32 1, %s3033_s10  }
  0xb5   : > { %s2259_s23 = sshll.u32 %s3049_s14, 8  ;;  %p3363_p9 = por %p238_p8, %p237_p12 }
  0xb6   : > { %s2134_s19 = sshll.u32 %s327_s11, 4  ;;  %s3370_s18 = scalar_lea.hbm %s3614_s0, %s2259_s23 }
  0xb7   : > { %s3659_s5 = scalar_select %p3363_p9, 1, 0 }
  0xb8   : > { %p3374_p6 = pnand %p2479_p7, %p3329_p1  ;;  %s331_s2 = scalar_lea.vmem [#allocation3], %s2134_s19 }
  0xb9   : > { %s338_s8 = sshll.u32 %s331_s2, 4  ;;  %s3380_s21 = scalar_lea.sflag [#allocation4], %s327_s11  ;;  %s3378_s8 = int_to_ptr.vmem [resolvable:$true] %s338_s8 }
  0xba   : > { %s2889_s3 = scalar_lea.hbm %s3370_s18, 256  ;;  %p2891_p2 = pneg %p3374_p6 }
  0xbb   : > { %p2890_p4 = scmp.ne.s32.totalorder %s3370_s18, %s2889_s3  ;;  %s2894_s30 = scalar_lea.hbm %s3614_s0, 512 }
  0xbc   : > { %p2895_p1 = scmp.lt.u32.totalorder %s3370_s18, %s3614_s0  ;;  %p2896_p13 = scmp.lt.u32.totalorder %s2894_s30, %s2889_s3 }
  0xbd   : > { %p2892_p11 = pnand %p2891_p2, %p2890_p4  ;;  %p2898_p3 = scmp.lt.u32.totalorder %s2889_s3, %s3370_s18 }
  0xbe   : > { %p2897_p0 = por %p2896_p13, %p2895_p1 }
  0xbf   : > { %p2893_p12 = pneg %p2892_p11 }
  0xc0   : > { %p2899_p8 = por %p2898_p3, %p2897_p0 }
  0xc2   : > { %p2900_p7 = pnand %p2899_p8, %p2893_p12 }
  0xc4   : > { %2903 = shalt.err (!%p2900_p7)
}
  0xc5   : > { %s2904_s11 = scalar_lea.vmem %s3378_s8, 256  ;;  %s3066_s19 = smov [#allocation3]  }
  0xc6   : > { %p2905_p4 = scmp.ne.s32.totalorder %s3378_s8, %s2904_s11  ;;  %s2909_s2 = sshll.u32 %s3066_s19, 4  ;;  %s2910_s2 = int_to_ptr.vmem [resolvable:$false] %s2909_s2 }
  0xc7   : > { %s2911_s4 = scalar_lea.vmem %s2910_s2, 512  ;;  %p2912_p5 = scmp.lt.s32.totalorder %s3378_s8, %s2910_s2 }
  0xc8   : > { %p2907_p11 = pnand %p2905_p4, %p2891_p2  ;;  %p2913_p1 = scmp.lt.s32.totalorder %s2911_s4, %s2904_s11 }
  0xca   : > { %p2908_p9 = pneg %p2907_p11  ;;  %p2914_p13 = por %p2913_p1, %p2912_p5 }
  0xcc   : > { %p2915_p0 = pnand %p2914_p13, %p2908_p9 }
  0xce   : > { %2918 = shalt.err (!%p2915_p0)
}
  0xcf   : > { %s3067_s6 = smov 128   ;;  %s3068_s3 = smov 8  }
  0xd0   : > { %2469 = dma.hbm_to_vmem [thread:$0]  (!%p3374_p6), %s3370_s18, 256, %s3378_s8, %s3380_s21, %s3067_s6, %s3067_s6, %s3068_s3  }
  0xd1   : > { %s3661_s16 = sld [smem:[#allocation22_spill]] }
  0xd7   : > { %p3662_p2 = scmp.ne.s32.totalorder %s3661_s16, 0 }
  0xd8   : > { %s352_s23 = sand.u32 (!%p3662_p2), 1, %s3029_s9  }
  0xd9   : > { %350 = sbr.rel (%p3662_p2) target bundleno = 3418 (0xd5a), region = 52  ;;  %s2138_s30 = sshll.u32 (!%p3662_p2), %s352_s23, 4 }
  0xda   : > { %s353_s19 = scalar_lea.sflag (!%p3662_p2), [#allocation4], %s352_s23  ;;  %s3411_s11 = scalar_lea.vmem (!%p3662_p2), [#allocation3], %s2138_s30 }
  0xe0   : > { %2992 = dma.done.wait (%p3335_p10), %s353_s19, 256  }
  0xe1   : > { %2994 = vsyncadd (%p3335_p10), %s353_s19, 4294967040  ;;  %p3663_p5 = scmp.ne.s32.totalorder %s3642_s17, 0 }
  0xe3   : > { %2996 = dma.done.wait (%p3663_p5), [#allocation7], 3136  }
  0xe4   : > { %2998 = vsyncadd (%p3663_p5), [#allocation7], 4294964160 }
  0xe5   : > { %3000 = dma.done.wait (%p3663_p5), [#allocation10], 5120  }
  0xe6   : > { %3002 = vsyncadd (%p3663_p5), [#allocation10], 4294962176 }
  0xe7   : > { %3004 = dma.done.wait (%p3663_p5), [#allocation13], 4096  }
  0xe8   : > { %3006 = vsyncadd (%p3663_p5), [#allocation13], 4294963200  ;;  %s406_s25 = sand.u32 1, %s3017_s28   ;;  %s3664_s8 = sld [smem:[#allocation20_spill]] }
  0xe9   : > { %s3432_s18 = sshll.u32 %s406_s25, 3 }
  0xea   : > { %s408_s24 = scalar_lea.vmem [#allocation14], %s3432_s18 }
  0xee   : > { %p2145_p10 = scmp.ne.s32.totalorder %s3664_s8, 0 }
  0xef   : > { %v414_v0 = vld [vmem:[%s3411_s11] sm:$0xff] (!%p2145_p10)  ;;  %v415_v1 = vld [vmem:[%s3411_s11 + $0x8] sm:$0xff] (!%p2145_p10)  ;;  %v3069_v23 = vmov (!%p2145_p10), 0   ;;  %v458_v38 = vlaneseq (!%p2145_p10)  ;;  %s3665_s2 = sld [smem:[#allocation24_spill]] (!%p2145_p10)  ;;  %vm603_vm0 = vcmask (!%p2145_p10), 261120   ;;  %s3070_s4 = smov (!%p2145_p10), 64  }
  0xf0   : > { %413 = sbr.rel (%p2145_p10) target bundleno = 899 (0x383), region = 80  ;;  %416 = vadd.xlane.f32.xlu0 (!%p2145_p10), %v414_v0  ;;  %v2597_v2 = vld [vmem:[#allocation8 + $0x8] ss:$12 sps:$4 sm:$0xff] (!%p2145_p10)   ;;  %v2599_v3 = vld [vmem:[#allocation8 + $0x4] ss:$12 sps:$4 sm:$0xff] (!%p2145_p10)   ;;  %580 = vmatprep.mubr.bf16.mxu0 (!%p2145_p10), %v3069_v23  ;;  %s3071_s6 = smov (!%p2145_p10), 96  }
  0xf1   : > { %v2600_v4 = vld [vmem:[#allocation8 + $0x20] ss:$12 sps:$4 sm:$0xff] (!%p2145_p10)   ;;  %548 = vmatprep.subr.bf16.mxu0 (!%p2145_p10), %v2597_v2  ;;  %v2602_v5 = vld [vmem:[#allocation8 + $0x1c] ss:$12 sps:$4 sm:$0xff] (!%p2145_p10)   ;;  %v2603_v6 = vld [vmem:[#allocation8 + $0x38] ss:$12 sps:$4 sm:$0xff] (!%p2145_p10)  }
  0xf2   : > { %549 = vmatpush1.bf16.msra.mxu0 (!%p2145_p10), %v2599_v3  ;;  %v2605_v15 = vld [vmem:[#allocation8 + $0x34] ss:$12 sps:$4 sm:$0xff] (!%p2145_p10)   ;;  %v2606_v16 = vld [vmem:[#allocation8 + $0x50] ss:$12 sps:$4 sm:$0xff] (!%p2145_p10)   ;;  %v2608_v17 = vld [vmem:[#allocation8 + $0x4c] ss:$12 sps:$4 sm:$0xff] (!%p2145_p10)  }
  0xf3   : > { %550 = vmatprep.subr.bf16.mxu0 (!%p2145_p10), %v2600_v4  ;;  %v2609_v18 = vld [vmem:[#allocation8 + $0x68] ss:$12 sps:$4 sm:$0xff] (!%p2145_p10)   ;;  %v2611_v19 = vld [vmem:[#allocation8 + $0x64] ss:$12 sps:$4 sm:$0xff] (!%p2145_p10)   ;;  %v2612_v20 = vld [vmem:[#allocation8 + $0x80] ss:$12 sps:$4 sm:$0xff] (!%p2145_p10)  }
  0xf4   : > { %418 = vadd.xlane.f32.xlu0 (!%p2145_p10), %v415_v1  ;;  %v2614_v21 = vld [vmem:[#allocation8 + $0x7c] ss:$12 sps:$4 sm:$0xff] (!%p2145_p10)   ;;  %v2615_v22 = vld [vmem:[#allocation8 + $0x98] ss:$12 sps:$4 sm:$0xff] (!%p2145_p10)   ;;  %v2617_v24 = vld [vmem:[#allocation8 + $0x94] ss:$12 sps:$4 sm:$0xff] (!%p2145_p10)  }
  0xf5   : > { %v2618_v25 = vld [vmem:[#allocation8 + $0xb0] ss:$12 sps:$4 sm:$0xff] (!%p2145_p10)   ;;  %v2620_v26 = vld [vmem:[#allocation8 + $0xac] ss:$12 sps:$4 sm:$0xff] (!%p2145_p10)   ;;  %v459_v39 = vshrl.u32 (!%p2145_p10), %v458_v38, 7  ;;  %s3072_s3 = smov (!%p2145_p10), 32  }
  0xf6   : > { %551 = vmatpush1.bf16.msra.mxu0 (!%p2145_p10), %v2602_v5  ;;  %v456_v41 = vld [vmem:[%s3665_s2 + $0x1] sm:$0x3] (!%p2145_p10) }
  0xf7   : > { %552 = vmatprep.subr.bf16.mxu0 %v2603_v6  ;;  %v460_v40 = vsub.s32 0, %v459_v39  ;;  %v464_v42 = vsub.s32 1, %v459_v39 }
  0xf9   : > { %v461_v43 = vrot.slane %v456_v41, %v460_v40  ;;  %v465_v45 = vrot.slane %v456_v41, %v464_v42 }
  0xfa   : > { %553 = vmatpush1.bf16.msra.mxu0 %v2605_v15 }
  0xfb   : > { %554 = vmatprep.subr.bf16.mxu0 %v2606_v16 }
  0xfe   : > { %555 = vmatpush1.bf16.msra.mxu0 %v2608_v17 }
  0xff   : > { %556 = vmatprep.subr.bf16.mxu0 %v2609_v18 }
 0x102   : > { %557 = vmatpush1.bf16.msra.mxu0 %v2611_v19 }
 0x103   : > { %558 = vmatprep.subr.bf16.mxu0 %v2612_v20 }
 0x106   : > { %559 = vmatpush1.bf16.msra.mxu0 %v2614_v21 }
 0x107   : > { %560 = vmatprep.subr.bf16.mxu0 %v2615_v22 }
 0x10a   : > { %561 = vmatpush1.bf16.msra.mxu0 %v2617_v24 }
 0x10b   : > { %562 = vmatprep.subr.bf16.mxu0 %v2618_v25 }
 0x10e   : > { %563 = vmatpush1.bf16.msra.mxu0 %v2620_v26 }
 0x17d   : > { %v417_v7 = vpop.xlane.xlu0 %416 }
 0x17e   : > { %v421_v8 = vmul.f32 0.0078125, %v417_v7 }
 0x180   : > { %v423_v9 = vsub.f32 %v414_v0, %v421_v8 }
 0x181   : > { %v419_v10 = vpop.xlane.xlu0 %418 }
 0x182   : > { %v422_v11 = vmul.f32 0.0078125, %v419_v10  ;;  %v425_v12 = vmul.f32 %v423_v9, %v423_v9 }
 0x184   : > { %v424_v13 = vsub.f32 %v415_v1, %v422_v11  ;;  %427 = vadd.xlane.f32.xlu1 %v425_v12 }
 0x186   : > { %v426_v14 = vmul.f32 %v424_v13, %v424_v13 }
 0x188   : > { %429 = vadd.xlane.f32.xlu1 %v426_v14 }
 0x211   : > { %v428_v27 = vpop.xlane.xlu1 %427 }
 0x212   : > { %v431_v28 = vmul.f32 0.0078125, %v428_v27 }
 0x214   : > { %v433_v29 = vadd.f32 1e-05, %v431_v28 }
 0x215   : > { %v430_v30 = vpop.xlane.xlu1 %429 }
 0x216   : > { %v432_v31 = vmul.f32 0.0078125, %v430_v30  ;;  %2621 = vrsqrt.f32 %v433_v29 }
 0x218   : > { %v434_v32 = vadd.f32 1e-05, %v432_v31 }
 0x21a   : > { %2623 = vrsqrt.f32 %v434_v32 }
 0x220   : > { %v2622_v33 = vpop.eup %2621 }
 0x221   : > { %v437_v35 = vmul.f32 %v2622_v33, %v423_v9 }
 0x224   : > { %v2624_v34 = vpop.eup %2623 }
 0x225   : > { %v438_v36 = vmul.f32 %v2624_v34, %v424_v13 }
 0x227   : > { %v439_v37 = vpack.c.bf16 %v438_v36, %v437_v35 }
 0x229   : > { %581 = vmatmul.mubr.bf16.vlgmr.msra.gmra.mrb[0].mxu0 %v439_v37 }
 0x2fc   : > { %v582_v44 = vpop.f32.mrb[0].mxu0 }
 0x2fd   : > { %v584_v46 = vpop.f32.mrb[1].mxu0  ;;  %v583_v48 = vadd.f32 %v582_v44, %v461_v43 }
 0x2fe   : > { %v586_v47 = vpop.f32.mrb[2].mxu0  ;;  %v585_v51 = vadd.f32 %v584_v46, %v465_v45 }
 0x2ff   : > { %v587_v49 = vadd.f32 %v586_v47, %v461_v43  ;;  %v588_v50 = vpop.f32.mrb[3].mxu0 }
 0x300   : > { %v589_v52 = vadd.f32 %v588_v50, %v465_v45 }
 0x301   : > { %v591_v53 = vpack.c.bf16 %v587_v49, %v583_v48 }
 0x302   : > { %v592_v54 = vpack.c.bf16 %v589_v52, %v585_v51 }
 0x303   : > { %604 = vst.msk [vmem:[#allocation2] sm:$0xff] %vm603_vm0, %v591_v53  ;;  %597 = vrot.lane.b32.xlu1 %v591_v53, %s3070_s4  ;;  %594 = vrot.lane.b32.xlu0 %v591_v53, %s3071_s6 }
 0x304   : > { %619 = vst.msk [vmem:[#allocation2 + $0x20] sm:$0xff] %vm603_vm0, %v592_v54 }
 0x307   : > { %600 = vrot.lane.b32.xlu1 %v591_v53, %s3072_s3  ;;  %612 = vrot.lane.b32.xlu0 %v592_v54, %s3070_s4 }
 0x30b   : > { %609 = vrot.lane.b32.xlu1 %v592_v54, %s3071_s6 }
 0x30f   : > { %615 = vrot.lane.b32.xlu1 %v592_v54, %s3072_s3 }
 0x375   : > { %v598_v55 = vpop.permute.xlu1 %597  ;;  %v595_v56 = vpop.permute.xlu0 %594 }
 0x376   : > { %606 = vst.msk [vmem:[#allocation2 + $0x10] sm:$0xff] %vm603_vm0, %v598_v55  ;;  %605 = vst.msk [vmem:[#allocation2 + $0x8] sm:$0xff] %vm603_vm0, %v595_v56 }
 0x379   : > { %v601_v57 = vpop.permute.xlu1 %600  ;;  %v613_v58 = vpop.permute.xlu0 %612 }
 0x37a   : > { %607 = vst.msk [vmem:[#allocation2 + $0x18] sm:$0xff] %vm603_vm0, %v601_v57  ;;  %621 = vst.msk [vmem:[#allocation2 + $0x30] sm:$0xff] %vm603_vm0, %v613_v58 }
 0x37d   : > { %v610_v59 = vpop.permute.xlu1 %609 }
 0x37e   : > { %620 = vst.msk [vmem:[#allocation2 + $0x28] sm:$0xff] %vm603_vm0, %v610_v59 }
 0x381   : > { %v616_v60 = vpop.permute.xlu1 %615 }
 0x382   : > { %622 = vst.msk [vmem:[#allocation2 + $0x38] sm:$0xff] %vm603_vm0, %v616_v60 }
 0x383 PF: > { %s3666_s16 = sld [smem:[#allocation20_spill]]  ;;  %v2625_v62 = vld [vmem:[#allocation8] ss:$12 sps:$4 sm:$0xff]   ;;  %v3073_v63 = vmov 0.0   ;;  %v2626_v0 = vld [vmem:[#allocation8 + $0x18] ss:$12 sps:$4 sm:$0xff]  }
 0x384   : > { %2338 = vmatprep.subr.bf16.mxu0 %v3073_v63  ;;  %2358 = vmatprep.subr.bf16.mxu1 %v3073_v63  ;;  %v2627_v1 = vld [vmem:[#allocation8 + $0x30] ss:$12 sps:$4 sm:$0xff]   ;;  %v2628_v6 = vld [vmem:[#allocation8 + $0x48] ss:$12 sps:$4 sm:$0xff]   ;;  %v2629_v7 = vld [vmem:[#allocation8 + $0x60] ss:$12 sps:$4 sm:$0xff]  }
 0x385   : > { %2339 = vmatpush3.bf16.msra.mxu0 %v2625_v62  ;;  %v2630_v8 = vld [vmem:[#allocation8 + $0x78] ss:$12 sps:$4 sm:$0xff]   ;;  %vm3074_vm1 = vmmov 0   ;;  %v2631_v9 = vld [vmem:[#allocation8 + $0x90] ss:$12 sps:$4 sm:$0xff]   ;;  %vm767_vm2 = vcmask 261120  }
 0x386   : > { %2340 = vmatprep.subr.bf16.mxu0 %v3073_v63  ;;  %2354 = vmatprep.mubr.msk.bf16.mxu0 %vm3074_vm1, %v3073_v63  ;;  %v2632_v10 = vld [vmem:[#allocation8 + $0xa8] ss:$12 sps:$4 sm:$0xff]   ;;  %v758_v11 = vld [vmem:[#allocation2] sm:$0xff]  ;;  %s3667_s8 = sld [smem:[#allocation24_spill]]  ;;  %s3075_s17 = smov 32   ;;  %v760_v28 = vld [vmem:[#allocation2 + $0x10] sm:$0xff] }
 0x387   : > { %2360 = vmatprep.mubr.msk.bf16.mxu1 %vm3074_vm1, %v3073_v63  ;;  %v772_v12 = vsel %vm767_vm2, %v758_v11, 0  ;;  %v759_v23 = vld [vmem:[#allocation2 + $0x8] sm:$0xff]  ;;  %s3076_s21 = smov 96   ;;  %s3077_s2 = smov 64   ;;  %v864_v29 = vsel %vm767_vm2, %v760_v28, 0  ;;  %v761_v31 = vld [vmem:[#allocation2 + $0x18] sm:$0xff] }
 0x388   : > { %2359 = vmatpush3.bf16.xpose.msra.mxu1 %v772_v12  ;;  %v818_v27 = vsel %vm767_vm2, %v759_v23, 0  ;;  %v910_v32 = vsel %vm767_vm2, %v761_v31, 0  ;;  %vm952_vm3 = vcmask 130048   ;;  %v763_v60 = vld [vmem:[#allocation2 + $0x20] sm:$0xff]  ;;  %vm1186_vm4 = vcmask 523264   ;;  %s3668_s3 = sld [smem:[#allocation23_spill]] }
 0x389   : > { %s2162_s23 = sshll.u32 %s3666_s16, 3  ;;  %2341 = vmatpush3.bf16.msra.mxu0 %v2626_v0  ;;  %2364 = vmatprep.subr.bf16.mxu1 %v3073_v63  ;;  %vm1188_vm5 = vcmask 785408   ;;  %s3670_s6 = sld [smem:[#allocation29_spill]] }
 0x38a   : > { %s624_s30 = scalar_lea.vmem %s3411_s11, %s2162_s23 [#allocation3]  ;;  %2342 = vmatprep.subr.bf16.mxu0 %v3073_v63  ;;  %s3669_s23 = sld [smem:[#allocation21_spill]] }
 0x38b   : > { %v3451_v61 = vld [vmem:[%s624_s30] sm:$0xff]  ;;  %p3671_p6 = scmp.ne.s32.totalorder %s3658_s1, 0  ;;  %s3079_s19 = smov [#allocation14]  }
 0x38c   : > { %626 = vadd.xlane.f32.xlu0 %v3451_v61  ;;  %v2163_v19 = vld [vmem:[%s3667_s8] ss:$0 sm:$0xff]  ;;  %s2923_s11 = sshll.u32 %s3079_s19, 4  ;;  %s2924_s11 = int_to_ptr.vmem [resolvable:$false] %s2923_s11 }
 0x38d   : > { %2343 = vmatpush3.bf16.msra.mxu0 %v2627_v1 }
 0x38e   : > { %2344 = vmatprep.subr.bf16.mxu0 %v3073_v63 }
 0x390   : > { %s2255_s30 = sshll.u32 %s3669_s23, 1 }
 0x391   : > { %2345 = vmatpush3.bf16.msra.mxu0 %v2628_v6  ;;  %s1988_s8 = sadd.s32 %s3666_s16, %s2255_s30  ;;  %s1977_s16 = scalar_lea.sflag [#allocation5], %s406_s25 }
 0x392   : > { %2346 = vmatprep.subr.bf16.mxu0 %v3073_v63 }
 0x395   : > { %2347 = vmatpush3.bf16.msra.mxu0 %v2629_v7 }
 0x396   : > { %2348 = vmatprep.subr.bf16.mxu0 %v3073_v63 }
 0x399   : > { %2349 = vmatpush3.bf16.msra.mxu0 %v2630_v8 }
 0x39a   : > { %2350 = vmatprep.subr.bf16.mxu0 %v3073_v63 }
 0x39d   : > { %2351 = vmatpush3.bf16.msra.mxu0 %v2631_v9 }
 0x39e   : > { %2352 = vmatprep.subr.bf16.mxu0 %v3073_v63 }
 0x3a1   : > { %2353 = vmatpush3.bf16.msra.mxu0 %v2632_v10 }
 0x3a2   : > { %2406 = vmatprep.subr.bf16.mxu0 %v3073_v63 }
 0x419   : > { %v627_v2 = vpop.xlane.xlu0 %626 }
 0x41a   : > { %v629_v3 = vmul.f32 0.0078125, %v627_v2 }
 0x41c   : > { %v630_v4 = vsub.f32 %v3451_v61, %v629_v3 }
 0x41e   : > { %v631_v5 = vmul.f32 %v630_v4, %v630_v4 }
 0x420   : > { %632 = vadd.xlane.f32.xlu0 %v631_v5 }
 0x4ad   : > { %v633_v13 = vpop.xlane.xlu0 %632 }
 0x4ae   : > { %v634_v14 = vmul.f32 0.0078125, %v633_v13 }
 0x4b0   : > { %v635_v15 = vadd.f32 1e-05, %v634_v14 }
 0x4b2   : > { %2721 = vrsqrt.f32 %v635_v15 }
 0x4bc   : > { %v2722_v16 = vpop.eup %2721 }
 0x4bd   : > { %v637_v17 = vmul.f32 %v2722_v16, %v630_v4 }
 0x4bf   : > { %v638_v18 = vpack.c.bf16 %v637_v17, %v637_v17 }
 0x4c1   : > { %2355 = vmatmul.mubr.bf16.vlgmr.msra.gmra.mrb[0].mxu0 %v638_v18  ;;  %v764_v18 = vld [vmem:[#allocation2 + $0x28] sm:$0xff] }
 0x4c2   : > { %2422 = vmatprep.mubr.msk.bf16.mxu0 %vm3074_vm1, %v3073_v63 }
 0x594   : > { %v744_v20 = vpop.f32.mrb[0].mxu0 }
 0x595   : > { %v745_v21 = vadd.f32 %v2163_v19, %v744_v20  ;;  %v2356_v22 = vpop.f32.mrb[1].mxu0 }
 0x596   : > { %v747_v24 = vpop.f32.mrb[2].mxu0 }
 0x597   : > { %v750_v25 = vpack.c.bf16 %v745_v21, %v745_v21  ;;  %v2357_v26 = vpop.f32.mrb[3].mxu0  ;;  %v765_v24 = vld [vmem:[#allocation2 + $0x30] sm:$0xff] }
 0x599   : > { %756 = vrot.lane.b32.xlu0 %v750_v25, %s3075_s17  ;;  %752 = vrot.lane.b32.xlu1 %v750_v25, %s3076_s21 }
 0x59a   : > { %2361 = vmatmul.mubr.msk.bf16.vlgmr.msra.gmra.mrb[0].mxu1 %vm767_vm2, %v750_v25 }
 0x59b   : > { %2365 = vmatpush3.bf16.xpose.msra.mxu1 %v818_v27  ;;  %2366 = vmatprep.mubr.msk.bf16.mxu1 %vm3074_vm1, %v3073_v63 }
 0x59c   : > { %2370 = vmatprep.subr.bf16.mxu1 %v3073_v63 }
 0x59d   : > { %754 = vrot.lane.b32.xlu1 %v750_v25, %s3077_s2 }
 0x60b   : > { %v753_v30 = vpop.permute.xlu1 %752  ;;  %v757_v34 = vpop.permute.xlu0 %756 }
 0x60c   : > { %2367 = vmatmul.mubr.msk.bf16.vlgmr.msra.gmra.mrb[4].mxu1 %vm767_vm2, %v753_v30 }
 0x60d   : > { %2371 = vmatpush3.bf16.xpose.msra.mxu1 %v864_v29  ;;  %2372 = vmatprep.mubr.msk.bf16.mxu1 %vm3074_vm1, %v3073_v63  ;;  %v766_v29 = vld [vmem:[#allocation2 + $0x38] sm:$0xff] }
 0x60e   : > { %2376 = vmatprep.subr.bf16.mxu1 %v3073_v63 }
 0x60f   : > { %v755_v33 = vpop.permute.xlu1 %754 }
 0x614   : > { %2373 = vmatmul.mubr.msk.bf16.vlgmr.msra.gmra.mrb[8].mxu1 %vm767_vm2, %v755_v33 }
 0x615   : > { %2377 = vmatpush3.bf16.xpose.msra.mxu1 %v910_v32  ;;  %2378 = vmatprep.mubr.msk.bf16.mxu1 %vm3074_vm1, %v3073_v63 }
 0x616   : > { %2382 = vmatprep.subr.bf16.mxu1 %v3073_v63 }
 0x61c   : > { %2379 = vmatmul.mubr.msk.bf16.vlgmr.msra.gmra.mrb[12].mxu1 %vm767_vm2, %v757_v34 }
 0x61d   : > { %2384 = vmatprep.mubr.msk.bf16.mxu1 %vm3074_vm1, %v3073_v63  ;;  %2383 = vmatpush3.bf16.msra.mxu1 %v763_v60 }
 0x61e   : > { %2388 = vmatprep.subr.bf16.mxu1 %v3073_v63 }
 0x66d   : > { %v808_v35 = vpop.f32.mrb[0].mxu1 }
 0x66e   : > { %v2362_v36 = vpop.f32.mrb[1].mxu1  ;;  %v953_v37 = vsel %vm952_vm3, %v808_v35, -inf }
 0x66f   : > { %954 = vmax.xlane.f32.xlu1 %v953_v37  ;;  %v811_v38 = vpop.f32.mrb[2].mxu1  ;;  %v2633_v37 = vld [vmem:[#allocation9] sm:$0xff]  }
 0x670   : > { %v2363_v39 = vpop.f32.mrb[3].mxu1  ;;  %2407 = vmatpush3.bf16.msra.mxu0 %v2633_v37  ;;  %v2634_v38 = vld [vmem:[#allocation9 + $0x8] sm:$0xff]   ;;  %v2677_v37 = vld [vmem:[#allocation11 + $0xc0] ss:$16 sps:$4 sm:$0xff]  }
 0x671   : > { %2408 = vmatprep.subr.bf16.mxu0 %v3073_v63  ;;  %v2635_v39 = vld [vmem:[#allocation9 + $0x10] sm:$0xff]  }
 0x674   : > { %2409 = vmatpush3.bf16.msra.mxu0 %v2634_v38  ;;  %v2680_v38 = vld [vmem:[#allocation11 + $0xc8] ss:$16 sps:$4 sm:$0xff]  }
 0x675   : > { %2410 = vmatprep.subr.bf16.mxu0 %v3073_v63 }
 0x678   : > { %2411 = vmatpush3.bf16.msra.mxu0 %v2635_v39  ;;  %v2685_v39 = vld [vmem:[#allocation11 + $0xe4] ss:$16 sps:$4 sm:$0xff]  }
 0x679   : > { %2412 = vmatprep.subr.bf16.mxu0 %v3073_v63 }
 0x6df   : > { %v854_v40 = vpop.f32.mrb[4].mxu1 }
 0x6e0   : > { %v2368_v41 = vpop.f32.mrb[5].mxu1  ;;  %v956_v42 = vsel %vm952_vm3, %v854_v40, -inf }
 0x6e1   : > { %957 = vmax.xlane.f32.xlu0 %v956_v42  ;;  %v857_v43 = vpop.f32.mrb[6].mxu1  ;;  %v2637_v41 = vld [vmem:[#allocation9 + $0x20] sm:$0xff]   ;;  %v2638_v42 = vld [vmem:[#allocation9 + $0x28] sm:$0xff]  }
 0x6e2   : > { %v2369_v44 = vpop.f32.mrb[7].mxu1  ;;  %v2639_v43 = vld [vmem:[#allocation9 + $0x30] sm:$0xff]  }
 0x6e7   : > { %v900_v45 = vpop.f32.mrb[8].mxu1 }
 0x6e8   : > { %v2374_v46 = vpop.f32.mrb[9].mxu1  ;;  %v959_v47 = vsel %vm952_vm3, %v900_v45, -inf }
 0x6e9   : > { %960 = vmax.xlane.f32.xlu1 %v959_v47  ;;  %v903_v48 = vpop.f32.mrb[10].mxu1 }
 0x6ea   : > { %v2375_v49 = vpop.f32.mrb[11].mxu1  ;;  %v2640_v48 = vld [vmem:[#allocation9 + $0x38] sm:$0xff]  }
 0x6ef   : > { %v946_v50 = vpop.f32.mrb[12].mxu1 }
 0x6f0   : > { %v2380_v51 = vpop.f32.mrb[13].mxu1  ;;  %v962_v52 = vsel %vm952_vm3, %v946_v50, -inf }
 0x6f1   : > { %963 = vmax.xlane.f32.xlu1 %v962_v52  ;;  %v949_v53 = vpop.f32.mrb[14].mxu1 }
 0x6f2   : > { %v2381_v54 = vpop.f32.mrb[15].mxu1 }
 0x6fc   : > { %v955_v55 = vpop.xlane.xlu1 %954 }
 0x6fd   : > { %v965_v56 = vsub.f32 %v808_v35, %v955_v55 }
 0x6ff   : > { %v969_v57 = vmul.f32 1.442695, %v965_v56 }
 0x701   : > { %2723 = vpow2.f32 %v969_v57 }
 0x70b   : > { %v2724_v58 = vpop.eup %2723 }
 0x70c   : > { %v977_v59 = vsel %vm952_vm3, %v2724_v58, 0.0 }
 0x70d   : > { %978 = vadd.xlane.f32.xlu1 %v977_v59 }
 0x76e   : > { %v958_v62 = vpop.xlane.xlu0 %957 }
 0x76f   : > { %v966_v0 = vsub.f32 %v854_v40, %v958_v62  ;;  %v2636_v40 = vld [vmem:[#allocation9 + $0x18] sm:$0xff]  }
 0x770   : > { %2413 = vmatpush3.bf16.msra.mxu0 %v2636_v40  ;;  %v2688_v40 = vld [vmem:[#allocation11 + $0xec] ss:$16 sps:$4 sm:$0xff]  }
 0x771   : > { %v971_v1 = vmul.f32 1.442695, %v966_v0  ;;  %2414 = vmatprep.subr.bf16.mxu0 %v3073_v63 }
 0x773   : > { %2725 = vpow2.f32 %v971_v1  ;;  %v2180_v1 = vld [vmem:[%s3668_s3] ss:$0 sm:$0xff] }
 0x774   : > { %2415 = vmatpush3.bf16.msra.mxu0 %v2637_v41  ;;  %v3078_v41 = vmov 0  }
 0x775   : > { %2416 = vmatprep.subr.bf16.mxu0 %v3073_v63 }
 0x776   : > { %v961_v2 = vpop.xlane.xlu1 %960 }
 0x777   : > { %v967_v3 = vsub.f32 %v900_v45, %v961_v2 }
 0x778   : > { %2417 = vmatpush3.bf16.msra.mxu0 %v2638_v42  ;;  %v2683_v42 = vld [vmem:[#allocation11 + $0xe0] ss:$16 sps:$4 sm:$0xff]  }
 0x779   : > { %v973_v4 = vmul.f32 1.442695, %v967_v3  ;;  %2418 = vmatprep.subr.bf16.mxu0 %v3073_v63 }
 0x77b   : > { %2727 = vpow2.f32 %v973_v4 }
 0x77c   : > { %2419 = vmatpush3.bf16.msra.mxu0 %v2639_v43  ;;  %v2686_v43 = vld [vmem:[#allocation11 + $0xe8] ss:$16 sps:$4 sm:$0xff]  }
 0x77d   : > { %v2726_v5 = vpop.eup %2725  ;;  %2420 = vmatprep.subr.bf16.mxu0 %v3073_v63 }
 0x77e   : > { %v964_v6 = vpop.xlane.xlu1 %963  ;;  %v980_v7 = vsel %vm952_vm3, %v2726_v5, 0.0 }
 0x77f   : > { %v968_v8 = vsub.f32 %v946_v50, %v964_v6  ;;  %981 = vadd.xlane.f32.xlu1 %v980_v7 }
 0x780   : > { %2421 = vmatpush3.bf16.msra.mxu0 %v2640_v48 }
 0x781   : > { %v975_v9 = vmul.f32 1.442695, %v968_v8  ;;  %v2641_v8 = vld [vmem:[#allocation11] ss:$16 sps:$4 sm:$0xff]  }
 0x783   : > { %2729 = vpow2.f32 %v975_v9  ;;  %v2643_v9 = vld [vmem:[#allocation11 + $0x4] ss:$16 sps:$4 sm:$0xff]  }
 0x785   : > { %v2728_v10 = vpop.eup %2727 }
 0x786   : > { %v983_v11 = vsel %vm952_vm3, %v2728_v10, 0.0 }
 0x787   : > { %984 = vadd.xlane.f32.xlu1 %v983_v11  ;;  %v2646_v11 = vld [vmem:[#allocation11 + $0xc] ss:$16 sps:$4 sm:$0xff]  }
 0x788   : > { %1568 = vmatprep.subr.bf16.mxu0 %v2646_v11  ;;  %v2712_v11 = vld [vmem:[#allocation12 + $0xa8] sm:$0xff]  }
 0x78d   : > { %v2730_v12 = vpop.eup %2729 }
 0x78e   : > { %v986_v13 = vsel %vm952_vm3, %v2730_v12, 0.0 }
 0x78f   : > { %987 = vadd.xlane.f32.xlu0 %v986_v13  ;;  %v2652_v13 = vld [vmem:[#allocation11 + $0x2c] ss:$16 sps:$4 sm:$0xff]  }
 0x79a   : > { %v979_v14 = vpop.xlane.xlu1 %978 }
 0x79b   : > { %2731 = vrcp.f32 %v979_v14  ;;  %v2647_v14 = vld [vmem:[#allocation11 + $0x20] ss:$16 sps:$4 sm:$0xff]  }
 0x7a5   : > { %v2732_v15 = vpop.eup %2731 }
 0x7a6   : > { %v993_v16 = vmul.f32 %v2732_v15, %v2724_v58  ;;  %v2650_v15 = vld [vmem:[#allocation11 + $0x28] ss:$16 sps:$4 sm:$0xff]  }
 0x7a8   : > { %v997_v17 = vpack.c.bf16 %v993_v16, %v993_v16  ;;  %v2655_v16 = vld [vmem:[#allocation11 + $0x44] ss:$16 sps:$4 sm:$0xff]  }
 0x7aa   : > { %2385 = vmatmul.mubr.msk.bf16.vlgmr.msra.gmra.mrb[16].mxu1 %vm952_vm3, %v997_v17  ;;  %v2653_v17 = vld [vmem:[#allocation11 + $0x40] ss:$16 sps:$4 sm:$0xff]  }
 0x7ab   : > { %2389 = vmatpush3.bf16.msra.mxu1 %v764_v18  ;;  %2390 = vmatprep.mubr.msk.bf16.mxu1 %vm3074_vm1, %v3073_v63  ;;  %v2656_v18 = vld [vmem:[#allocation11 + $0x48] ss:$16 sps:$4 sm:$0xff]  }
 0x7ac   : > { %2394 = vmatprep.subr.bf16.mxu1 %v3073_v63 }
 0x80c   : > { %v982_v19 = vpop.xlane.xlu1 %981 }
 0x80d   : > { %2733 = vrcp.f32 %v982_v19  ;;  %v2661_v19 = vld [vmem:[#allocation11 + $0x64] ss:$16 sps:$4 sm:$0xff]  }
 0x814   : > { %v985_v20 = vpop.xlane.xlu1 %984 }
 0x815   : > { %2735 = vrcp.f32 %v985_v20  ;;  %v2664_v20 = vld [vmem:[#allocation11 + $0x6c] ss:$16 sps:$4 sm:$0xff]  }
 0x817   : > { %v2734_v21 = vpop.eup %2733 }
 0x818   : > { %v994_v22 = vmul.f32 %v2734_v21, %v2726_v5  ;;  %v2659_v21 = vld [vmem:[#allocation11 + $0x60] ss:$16 sps:$4 sm:$0xff]  }
 0x81a   : > { %v998_v23 = vpack.c.bf16 %v994_v22, %v994_v22  ;;  %v2662_v22 = vld [vmem:[#allocation11 + $0x68] ss:$16 sps:$4 sm:$0xff]  }
 0x81c   : > { %v988_v25 = vpop.xlane.xlu0 %987  ;;  %2391 = vmatmul.mubr.msk.bf16.vlgmr.msra.gmra.mrb[20].mxu1 %vm952_vm3, %v998_v23 }
 0x81d   : > { %2737 = vrcp.f32 %v988_v25  ;;  %2395 = vmatpush3.bf16.msra.mxu1 %v765_v24  ;;  %2396 = vmatprep.mubr.msk.bf16.mxu1 %vm3074_vm1, %v3073_v63 }
 0x81e   : > { %2400 = vmatprep.subr.bf16.mxu1 %v3073_v63 }
 0x81f   : > { %v2736_v26 = vpop.eup %2735 }
 0x820   : > { %v995_v27 = vmul.f32 %v2736_v26, %v2728_v10  ;;  %v2644_v10 = vld [vmem:[#allocation11 + $0x8] ss:$16 sps:$4 sm:$0xff]  }
 0x822   : > { %v999_v28 = vpack.c.bf16 %v995_v27, %v995_v27  ;;  %v2667_v27 = vld [vmem:[#allocation11 + $0x84] ss:$16 sps:$4 sm:$0xff]  }
 0x824   : > { %2397 = vmatmul.mubr.msk.bf16.vlgmr.msra.gmra.mrb[24].mxu1 %vm952_vm3, %v999_v28  ;;  %v2670_v28 = vld [vmem:[#allocation11 + $0x8c] ss:$16 sps:$4 sm:$0xff]  }
 0x825   : > { %2401 = vmatpush3.bf16.msra.mxu1 %v766_v29  ;;  %2402 = vmatprep.mubr.msk.bf16.mxu1 %vm3074_vm1, %v3073_v63  ;;  %v2665_v29 = vld [vmem:[#allocation11 + $0x80] ss:$16 sps:$4 sm:$0xff]  }
 0x826   : > { %1527 = vmatprep.subr.bf16.mxu1 %v2643_v9  ;;  %v2710_v9 = vld [vmem:[#allocation12 + $0xe8] sm:$0xff]  }
 0x827   : > { %v2738_v30 = vpop.eup %2737 }
 0x828   : > { %v996_v31 = vmul.f32 %v2738_v30, %v2730_v12  ;;  %v2649_v12 = vld [vmem:[#allocation11 + $0x24] ss:$16 sps:$4 sm:$0xff]   ;;  %v2668_v30 = vld [vmem:[#allocation11 + $0x88] ss:$16 sps:$4 sm:$0xff]  }
 0x82a   : > { %v1000_v32 = vpack.c.bf16 %v996_v31, %v996_v31  ;;  %v2673_v31 = vld [vmem:[#allocation11 + $0xa4] ss:$16 sps:$4 sm:$0xff]  }
 0x82c   : > { %2403 = vmatmul.mubr.msk.bf16.vlgmr.msra.gmra.mrb[28].mxu1 %vm952_vm3, %v1000_v32  ;;  %v2671_v32 = vld [vmem:[#allocation11 + $0xa0] ss:$16 sps:$4 sm:$0xff]  }
 0x82d   : > { %1528 = vmatpush1.bf16.msra.mxu1 %v2641_v8  ;;  %1559 = vmatprep.mubr.bf16.mxu1 %v3078_v41  ;;  %v2709_v8 = vld [vmem:[#allocation12 + $0x68] sm:$0xff]  }
 0x82e   : > { %1529 = vmatprep.subr.bf16.mxu1 %v2649_v12  ;;  %v2713_v12 = vld [vmem:[#allocation12 + $0x70] sm:$0xff]  }
 0x831   : > { %1530 = vmatpush1.bf16.msra.mxu1 %v2647_v14  ;;  %v2715_v14 = vld [vmem:[#allocation12 + $0x30] sm:$0xff]  }
 0x832   : > { %1531 = vmatprep.subr.bf16.mxu1 %v2655_v16  ;;  %v2717_v16 = vld [vmem:[#allocation12 + $0x78] sm:$0xff]  }
 0x835   : > { %1532 = vmatpush1.bf16.msra.mxu1 %v2653_v17  ;;  %v2719_v17 = vld [vmem:[#allocation12 + $0x38] sm:$0xff]  }
 0x836   : > { %1533 = vmatprep.subr.bf16.mxu1 %v2661_v19  ;;  %v1347_v19 = vlaneseq }
 0x839   : > { %1534 = vmatpush1.bf16.msra.mxu1 %v2659_v21 }
 0x83a   : > { %1535 = vmatprep.subr.bf16.mxu1 %v2667_v27 }
 0x83d   : > { %1536 = vmatpush1.bf16.msra.mxu1 %v2665_v29 }
 0x83e   : > { %1537 = vmatprep.subr.bf16.mxu1 %v2673_v31 }
 0x841   : > { %1538 = vmatpush1.bf16.msra.mxu1 %v2671_v32 }
 0x87d   : > { %v1038_v33 = vpop.f32.mrb[16].mxu1 }
 0x87e   : > { %v2386_v34 = vpop.f32.mrb[17].mxu1 }
 0x87f   : > { %v1041_v35 = vpop.f32.mrb[18].mxu1  ;;  %v2676_v34 = vld [vmem:[#allocation11 + $0xac] ss:$16 sps:$4 sm:$0xff]  }
 0x880   : > { %v2387_v36 = vpop.f32.mrb[19].mxu1  ;;  %v2679_v35 = vld [vmem:[#allocation11 + $0xc4] ss:$16 sps:$4 sm:$0xff]  }
 0x881   : > { %v2682_v36 = vld [vmem:[#allocation11 + $0xcc] ss:$16 sps:$4 sm:$0xff]   ;;  %1539 = vmatprep.subr.bf16.mxu1 %v2679_v35 }
 0x882   : > { %1540 = vmatpush1.bf16.msra.mxu1 %v2677_v37 }
 0x883   : > { %1541 = vmatprep.subr.bf16.mxu1 %v2685_v39 }
 0x886   : > { %1542 = vmatpush1.bf16.msra.mxu1 %v2683_v42 }
 0x8ef   : > { %v1081_v44 = vpop.f32.mrb[20].mxu1 }
 0x8f0   : > { %1174 = vrot.lane.b32.xlu1 %v1081_v44, %s3075_s17  ;;  %v2392_v45 = vpop.f32.mrb[21].mxu1  ;;  %v2689_v44 = vld [vmem:[#allocation12 + $0x40] sm:$0xff]   ;;  %s2256_s17 = sshll.u32 %s1988_s8, 7  ;;  %s2925_s8 = scalar_lea.vmem %s2924_s11, 256 }
 0x8f1   : > { %v1084_v46 = vpop.f32.mrb[22].mxu1  ;;  %v2690_v45 = vld [vmem:[#allocation12 + $0xc0] sm:$0xff]   ;;  %2294 = vmatprep.subr.bf16.mxu1 %v2689_v44  ;;  %s3548_s23 = scalar_lea.hbm %s3670_s6, %s2256_s17 }
 0x8f2   : > { %v2393_v47 = vpop.f32.mrb[23].mxu1 }
 0x8f7   : > { %v1124_v49 = vpop.f32.mrb[24].mxu1 }
 0x8f8   : > { %1178 = vrot.lane.b32.xlu0 %v1124_v49, %s3077_s2  ;;  %v2398_v50 = vpop.f32.mrb[25].mxu1 }
 0x8f9   : > { %v1127_v51 = vpop.f32.mrb[26].mxu1 }
 0x8fa   : > { %v2399_v52 = vpop.f32.mrb[27].mxu1  ;;  %v2691_v51 = vld [vmem:[#allocation12] sm:$0xff]  }
 0x8fb   : > { %v2692_v52 = vld [vmem:[#allocation12 + $0x80] sm:$0xff]  }
 0x8ff   : > { %v1167_v53 = vpop.f32.mrb[28].mxu1 }
 0x900   : > { %1182 = vrot.lane.b32.xlu1 %v1167_v53, %s3076_s21  ;;  %v2404_v54 = vpop.f32.mrb[29].mxu1  ;;  %s1992_s21 = sshll.u32 %s408_s24, 4  ;;  %s3550_s21 = int_to_ptr.vmem [resolvable:$true] %s1992_s21 }
 0x901   : > { %v1170_v55 = vpop.f32.mrb[30].mxu1  ;;  %v2693_v54 = vld [vmem:[#allocation12 + $0x48] sm:$0xff]   ;;  %s2919_s30 = scalar_lea.vmem %s3550_s21, 128  ;;  %p2926_p8 = scmp.lt.s32.totalorder %s3550_s21, %s2924_s11 }
 0x902   : > { %v2405_v56 = vpop.f32.mrb[31].mxu1  ;;  %v2694_v55 = vld [vmem:[#allocation12 + $0xc8] sm:$0xff]   ;;  %p2920_p9 = scmp.ne.s32.totalorder %s3550_s21, %s2919_s30  ;;  %p2927_p7 = scmp.lt.s32.totalorder %s2925_s8, %s2919_s30 }
 0x903   : > { %v2695_v56 = vld [vmem:[#allocation12 + $0x8] sm:$0xff]  }
 0x904   : > { %p2921_p12 = pnand %p2920_p9, %p3671_p6  ;;  %p2928_p4 = por %p2927_p7, %p2926_p8 }
 0x906   : > { %p2922_p3 = pneg %p2921_p12 }
 0x908   : > { %p2929_p11 = pnand %p2928_p4, %p2922_p3 }
 0x962   : > { %v1175_v57 = vpop.permute.xlu1 %1174 }
 0x963   : > { %v1185_v63 = vsel %vm767_vm2, %v1038_v33, %v1175_v57  ;;  %v2674_v33 = vld [vmem:[#allocation11 + $0xa8] ss:$16 sps:$4 sm:$0xff]  }
 0x964   : > { %v2696_v57 = vld [vmem:[#allocation12 + $0x88] sm:$0xff]  }
 0x96a   : > { %v1179_v58 = vpop.permute.xlu0 %1178 }
 0x96b   : > { %v1187_v59 = vsel %vm1186_vm4, %v1185_v63, %v1179_v58  ;;  %v2697_v58 = vld [vmem:[#allocation12 + $0x50] sm:$0xff]  }
 0x96c   : > { %v2698_v63 = vld [vmem:[#allocation12 + $0xd0] sm:$0xff]  }
 0x972   : > { %v1183_v60 = vpop.permute.xlu1 %1182 }
 0x973   : > { %v1189_v62 = vsel %vm1188_vm5, %v1187_v59, %v1183_v60  ;;  %v2699_v59 = vld [vmem:[#allocation12 + $0x10] sm:$0xff]  }
 0x974   : > { %v1190_v0 = vpack.c.bf16 %v1189_v62, %v1189_v62  ;;  %v2700_v60 = vld [vmem:[#allocation12 + $0x90] sm:$0xff]   ;;  %v2701_v62 = vld [vmem:[#allocation12 + $0x58] sm:$0xff]  }
 0x976   : > { %2423 = vmatmul.mubr.bf16.vlgmr.msra.gmra.mrb[4].mxu0 %v1190_v0  ;;  %v2702_v0 = vld [vmem:[#allocation12 + $0xd8] sm:$0xff]  }
 0x977   : > { %1569 = vmatpush1.bf16.msra.mxu0 %v2644_v10  ;;  %1600 = vmatprep.mubr.bf16.mxu0 %v3078_v41  ;;  %v2711_v10 = vld [vmem:[#allocation12 + $0x28] sm:$0xff]  }
 0x978   : > { %1570 = vmatprep.subr.bf16.mxu0 %v2652_v13  ;;  %v2714_v13 = vld [vmem:[#allocation12 + $0xf0] sm:$0xff]  }
 0x97b   : > { %1571 = vmatpush1.bf16.msra.mxu0 %v2650_v15  ;;  %v2716_v15 = vld [vmem:[#allocation12 + $0xb0] sm:$0xff]  }
 0xa49   : > { %v1294_v2 = vpop.f32.mrb[4].mxu0 }
 0xa4a   : > { %v1295_v3 = vadd.f32 %v2180_v1, %v1294_v2  ;;  %v2424_v4 = vpop.f32.mrb[5].mxu0  ;;  %v2703_v1 = vld [vmem:[#allocation12 + $0x18] sm:$0xff]  }
 0xa4b   : > { %v1297_v5 = vpop.f32.mrb[6].mxu0  ;;  %v2704_v2 = vld [vmem:[#allocation12 + $0x98] sm:$0xff]   ;;  %v2706_v4 = vld [vmem:[#allocation12 + $0xe0] sm:$0xff]  }
 0xa4c   : > { %v3533_v6 = vadd.f32 %v1295_v3, %v3451_v61  ;;  %v2425_v7 = vpop.f32.mrb[7].mxu0  ;;  %v2658_v61 = vld [vmem:[#allocation11 + $0x4c] ss:$16 sps:$4 sm:$0xff]   ;;  %v2705_v3 = vld [vmem:[#allocation12 + $0x60] sm:$0xff]  }
 0xa4d   : > { %1572 = vmatprep.subr.bf16.mxu0 %v2658_v61  ;;  %v2707_v5 = vld [vmem:[#allocation12 + $0x20] sm:$0xff]   ;;  %v2718_v61 = vld [vmem:[#allocation12 + $0xf8] sm:$0xff]  }
 0xa4e   : > { %1301 = vadd.xlane.f32.xlu1 %v3533_v6  ;;  %1573 = vmatpush1.bf16.msra.mxu0 %v2656_v18  ;;  %v2708_v7 = vld [vmem:[#allocation12 + $0xa0] sm:$0xff]   ;;  %v2720_v18 = vld [vmem:[#allocation12 + $0xb8] sm:$0xff]  }
 0xa4f   : > { %1574 = vmatprep.subr.bf16.mxu0 %v2664_v20  ;;  %v1348_v20 = vshrl.u32 %v1347_v19, 7 }
 0xa51   : > { %v1349_v21 = vsub.s32 0, %v1348_v20 }
 0xa52   : > { %1575 = vmatpush1.bf16.msra.mxu0 %v2662_v22  ;;  %v1357_v22 = vsub.s32 2, %v1348_v20 }
 0xa53   : > { %1576 = vmatprep.subr.bf16.mxu0 %v2670_v28 }
 0xa56   : > { %1577 = vmatpush1.bf16.msra.mxu0 %v2668_v30 }
 0xa57   : > { %1578 = vmatprep.subr.bf16.mxu0 %v2676_v34 }
 0xa5a   : > { %1579 = vmatpush1.bf16.msra.mxu0 %v2674_v33 }
 0xa5b   : > { %1580 = vmatprep.subr.bf16.mxu0 %v2682_v36 }
 0xa5e   : > { %1581 = vmatpush1.bf16.msra.mxu0 %v2680_v38 }
 0xa5f   : > { %1582 = vmatprep.subr.bf16.mxu0 %v2688_v40 }
 0xa62   : > { %1583 = vmatpush1.bf16.msra.mxu0 %v2686_v43 }
 0xa63   : > { %2316 = vmatprep.subr.bf16.mxu0 %v2690_v45 }
 0xadb   : > { %v1302_v23 = vpop.xlane.xlu1 %1301 }
 0xadc   : > { %v1303_v24 = vmul.f32 0.0078125, %v1302_v23  ;;  %v1345_v23 = vld [vmem:[#allocation6] sm:$0xf] }
 0xadd   : > { %v1358_v27 = vrot.slane %v1345_v23, %v1357_v22 }
 0xade   : > { %v1304_v25 = vsub.f32 %v3533_v6, %v1303_v24  ;;  %v1353_v24 = vsub.s32 1, %v1348_v20 }
 0xae0   : > { %v1305_v26 = vmul.f32 %v1304_v25, %v1304_v25  ;;  %v1354_v28 = vrot.slane %v1345_v23, %v1353_v24 }
 0xae2   : > { %1306 = vadd.xlane.f32.xlu0 %v1305_v26  ;;  %v1350_v26 = vrot.slane %v1345_v23, %v1349_v21 }
 0xb6f   : > { %v1307_v46 = vpop.xlane.xlu0 %1306 }
 0xb70   : > { %v1308_v47 = vmul.f32 0.0078125, %v1307_v46 }
 0xb72   : > { %v1309_v48 = vadd.f32 1e-05, %v1308_v47 }
 0xb74   : > { %2739 = vrsqrt.f32 %v1309_v48 }
 0xb7e   : > { %v2740_v49 = vpop.eup %2739 }
 0xb7f   : > { %v1311_v50 = vmul.f32 %v2740_v49, %v1304_v25  ;;  %v1361_v25 = vsub.s32 3, %v1348_v20 }
 0xb81   : > { %v1312_v53 = vpack.c.bf16 %v1311_v50, %v1311_v50  ;;  %v1362_v29 = vrot.slane %v1345_v23, %v1361_v25 }
 0xb83   : > { %1560 = vmatmul.mubr.bf16.vlgmr.msra.gmra.mrb[32].mxu1 %v1312_v53  ;;  %1601 = vmatmul.mubr.bf16.vlgmr.msra.gmra.mrb[8].mxu0 %v1312_v53 }
 0xb84   : > { %2295 = vmatpush3.bf16.msra.mxu1 %v2691_v51  ;;  %2317 = vmatpush3.bf16.msra.mxu0 %v2692_v52 }
 0xb85   : > { %2296 = vmatprep.subr.bf16.mxu1 %v2693_v54  ;;  %2318 = vmatprep.subr.bf16.mxu0 %v2694_v55 }
 0xb88   : > { %2297 = vmatpush3.bf16.msra.mxu1 %v2695_v56  ;;  %2319 = vmatpush3.bf16.msra.mxu0 %v2696_v57 }
 0xb89   : > { %2298 = vmatprep.subr.bf16.mxu1 %v2697_v58  ;;  %2320 = vmatprep.subr.bf16.mxu0 %v2698_v63 }
 0xb8c   : > { %2299 = vmatpush3.bf16.msra.mxu1 %v2699_v59  ;;  %2321 = vmatpush3.bf16.msra.mxu0 %v2700_v60 }
 0xb8d   : > { %2300 = vmatprep.subr.bf16.mxu1 %v2701_v62  ;;  %2322 = vmatprep.subr.bf16.mxu0 %v2702_v0 }
 0xb90   : > { %2301 = vmatpush3.bf16.msra.mxu1 %v2703_v1  ;;  %2323 = vmatpush3.bf16.msra.mxu0 %v2704_v2 }
 0xb91   : > { %2302 = vmatprep.subr.bf16.mxu1 %v2705_v3  ;;  %2324 = vmatprep.subr.bf16.mxu0 %v2706_v4 }
 0xb94   : > { %2303 = vmatpush3.bf16.msra.mxu1 %v2707_v5  ;;  %2325 = vmatpush3.bf16.msra.mxu0 %v2708_v7  ;;  %v2221_v5 = vld [vmem:[%s3668_s3 + $0x1] ss:$0 sm:$0xff] }
 0xb95   : > { %2304 = vmatprep.subr.bf16.mxu1 %v2709_v8  ;;  %2326 = vmatprep.subr.bf16.mxu0 %v2710_v9 }
 0xb98   : > { %2305 = vmatpush3.bf16.msra.mxu1 %v2711_v10  ;;  %2327 = vmatpush3.bf16.msra.mxu0 %v2712_v11 }
 0xb99   : > { %2306 = vmatprep.subr.bf16.mxu1 %v2713_v12  ;;  %2328 = vmatprep.subr.bf16.mxu0 %v2714_v13 }
 0xb9c   : > { %2307 = vmatpush3.bf16.msra.mxu1 %v2715_v14  ;;  %2329 = vmatpush3.bf16.msra.mxu0 %v2716_v15 }
 0xb9d   : > { %2308 = vmatprep.subr.bf16.mxu1 %v2717_v16  ;;  %2330 = vmatprep.subr.bf16.mxu0 %v2718_v61 }
 0xba0   : > { %2309 = vmatpush3.bf16.msra.mxu1 %v2719_v17  ;;  %2331 = vmatpush3.bf16.msra.mxu0 %v2720_v18 }
 0xc56   : > { %v1561_v30 = vpop.f32.mrb[32].mxu1  ;;  %v1602_v31 = vpop.f32.mrb[8].mxu0 }
 0xc57   : > { %v1562_v32 = vadd.f32 %v1561_v30, %v1350_v26  ;;  %v1603_v33 = vadd.f32 %v1602_v31, %v1358_v27  ;;  %v1563_v34 = vpop.f32.mrb[33].mxu1  ;;  %v1604_v35 = vpop.f32.mrb[9].mxu0 }
 0xc58   : > { %v1564_v36 = vadd.f32 %v1563_v34, %v1354_v28  ;;  %v1605_v37 = vadd.f32 %v1604_v35, %v1362_v29  ;;  %v1565_v38 = vpop.f32.mrb[34].mxu1  ;;  %v1606_v39 = vpop.f32.mrb[10].mxu0 }
 0xc59   : > { %v1613_v40 = vmul.f32 0.70710677, %v1562_v32  ;;  %v1615_v41 = vmul.f32 0.70710677, %v1603_v33  ;;  %v1566_v44 = vpop.f32.mrb[35].mxu1  ;;  %v1607_v45 = vpop.f32.mrb[11].mxu0 }
 0xc5a   : > { %v1614_v42 = vmul.f32 0.70710677, %v1564_v36  ;;  %v1616_v43 = vmul.f32 0.70710677, %v1605_v37  ;;  %v1609_v50 = vmul.f32 0.5, %v1562_v32  ;;  %v1611_v53 = vmul.f32 0.5, %v1603_v33 }
 0xc5b   : > { %2741 = verf.f32 %v1613_v40  ;;  %v1610_v54 = vmul.f32 0.5, %v1564_v36  ;;  %v1612_v57 = vmul.f32 0.5, %v1605_v37 }
 0xc5c   : > { %2743 = verf.f32 %v1615_v41 }
 0xc5d   : > { %2745 = verf.f32 %v1614_v42 }
 0xc5e   : > { %2747 = verf.f32 %v1616_v43 }
 0xc65   : > { %v2742_v46 = vpop.eup %2741 }
 0xc66   : > { %v2744_v47 = vpop.eup %2743  ;;  %v1621_v48 = vadd.f32 1.0, %v2742_v46 }
 0xc67   : > { %v2746_v49 = vpop.eup %2745  ;;  %v1623_v51 = vadd.f32 1.0, %v2744_v47 }
 0xc68   : > { %v2748_v52 = vpop.eup %2747  ;;  %v1622_v55 = vadd.f32 1.0, %v2746_v49  ;;  %v1625_v56 = vmul.f32 %v1621_v48, %v1609_v50 }
 0xc69   : > { %v1624_v58 = vadd.f32 1.0, %v2748_v52  ;;  %v1627_v63 = vmul.f32 %v1623_v51, %v1611_v53 }
 0xc6a   : > { %v1626_v59 = vmul.f32 %v1622_v55, %v1610_v54  ;;  %v1629_v0 = vpack.c.bf16 %v1625_v56, %v1625_v56 }
 0xc6b   : > { %v1628_v60 = vmul.f32 %v1624_v58, %v1612_v57  ;;  %v1631_v2 = vpack.c.bf16 %v1627_v63, %v1627_v63 }
 0xc6c   : > { %v1630_v62 = vpack.c.bf16 %v1626_v59, %v1626_v59 }
 0xc6d   : > { %v1632_v1 = vpack.c.bf16 %v1628_v60, %v1628_v60 }
 0xc6e   : > { %1926 = vmatprep.mubr.bf16.mxu1 %v1630_v62 }
 0xc6f   : > { %1966 = vmatprep.mubr.bf16.mxu0 %v1632_v1  ;;  %1927 = vmatmul.mubr.bf16.vlgmr.msra.gmra.mrb[36].mxu1 %v1629_v0 }
 0xc70   : > { %1967 = vmatmul.mubr.bf16.vlgmr.msra.gmra.mrb[12].mxu0 %v1631_v2 }
 0xd42   : > { %v2310_v3 = vpop.f32.mrb[36].mxu1 }
 0xd43   : > { %v2332_v4 = vpop.f32.mrb[12].mxu0  ;;  %v2311_v7 = vpop.f32.mrb[37].mxu1 }
 0xd44   : > { %v2312_v8 = vadd.f32 %v2311_v7, %v2310_v3  ;;  %v2333_v9 = vpop.f32.mrb[13].mxu0  ;;  %v2313_v10 = vpop.f32.mrb[38].mxu1 }
 0xd45   : > { %v2334_v11 = vadd.f32 %v2333_v9, %v2332_v4  ;;  %v2335_v12 = vpop.f32.mrb[14].mxu0  ;;  %v2314_v13 = vpop.f32.mrb[39].mxu1 }
 0xd46   : > { %v1929_v14 = vadd.f32 %v2312_v8, %v2221_v5  ;;  %v2336_v15 = vpop.f32.mrb[15].mxu0 }
 0xd48   : > { %v1969_v16 = vadd.f32 %v2334_v11, %v1929_v14 }
 0xd4a   : > { %v1974_v61 = vadd.f32 %v1969_v16, %v3533_v6 }
 0xd4c   : > { %1975 = vst [vmem:[%s408_s24] sm:$0xff] %v1974_v61 }
 0xd4d   : > { %2932 = shalt.err (!%p2929_p11)
}
 0xd4e   : > { %s2933_s25 = scalar_lea.hbm %s3548_s23, 128  ;;  %s2937_s17 = scalar_lea.hbm %s3670_s6, 512 }
 0xd4f   : > { %p2934_p1 = scmp.ne.s32.totalorder %s3548_s23, %s2933_s25  ;;  %p2938_p2 = scmp.lt.u32.totalorder %s3548_s23, %s3670_s6 }
 0xd50   : > { %p2939_p5 = scmp.lt.u32.totalorder %s2937_s17, %s2933_s25  ;;  %p2941_p9 = scmp.lt.u32.totalorder %s2933_s25, %s3548_s23 }
 0xd51   : > { %p2935_p13 = pnand %p2934_p1, %p3671_p6 }
 0xd52   : > { %p2940_p10 = por %p2939_p5, %p2938_p2 }
 0xd53   : > { %p2936_p0 = pneg %p2935_p13 }
 0xd54   : > { %p2942_p12 = por %p2941_p9, %p2940_p10 }
 0xd56   : > { %p2943_p3 = pnand %p2942_p12, %p2936_p0 }
 0xd58   : > { %2946 = shalt.err (!%p2943_p3)
}
 0xd59   : > { %2448 = dma.vmem_to_hbm [thread:$0]  (%p3671_p6), %s3550_s21, 128, %s3548_s23, %s1977_s16  }
 0xd5a PF: > { %p2485_p8 = scmp.ge.s32.totalorder %s3053_s15, 2  ;;  %s2004_s30 = sand.u32 1, %s3013_s27  }
 0xd5b   : > { %p3672_p7 = scmp.ne.s32.totalorder %s3659_s5, 0  ;;  %s2005_s19 = scalar_lea.sflag [#allocation5], %s2004_s30 }
 0xd5d   : > { %p2471_p4 = pnand %p2485_p8, %p3672_p7 }
 0xd5f   : > { %3008 = dma.done.wait (!%p2471_p4), %s2005_s19, 128  }
 0xd60   : > { %3010 = vsyncadd (!%p2471_p4), %s2005_s19, 4294967168  ;;  %s27_s15 = sadd.s32 1, %s3053_s15   ;;  %s3673_s1 = smov %s3689_s12 }
 0xd61   : > { %p24_p11 = scmp.ge.s32.totalorder %s27_s15, 6   ;;  %s3674_s27 = smov %s3017_s28 }
 0xd62   : > { %s3675_s28 = smov %s3021_s29  ;;  %s3676_s29 = smov %s3358_s20 }
 0xd63   : > { %s3677_s30 = smov %s3029_s9  ;;  %s3678_s9 = smov %s3033_s10 }
 0xd64   : > { %s3679_s10 = smov %s3355_s26  ;;  %s3680_s11 = smov %s3045_s13 }
 0xd65   : > { %s3681_s12 = smov %s3049_s14  ;;  %s3682_s13 = smov %s3685_s22 }
 0xd66   : > { %s3683_s14 = smov %s3673_s1  ;;  %26 = sbr.rel (!%p24_p11) target bundleno = 20 (0x14), region = 124 }
 0xd6d   :  { %2010 = vsyncpa [#allocation4], 1 }
 0xd6e   :  { %2012 = vsyncpa [#allocation4 + $0x1], 1 }
 0xd6f   :  { %2013 = vsyncpa [#allocation7], 1 }
 0xd70   :  { %2014 = vsyncpa [#allocation10], 1 }
 0xd71   :  { %2015 = vsyncpa [#allocation13], 1 }
 0xd72   :  { %2016 = vsyncpa [#allocation5], 1 }
 0xd73   :  { %2018 = vsyncpa [#allocation5 + $0x1], 1 }

</bundles_post_ra>
